<compile_context>
chip_gen: v6e
topology: v6e:2x2x1
jax: 0.10.0
libtpu: 0.0.40
codegen_flags: <defaults>
</compile_context>

<pallas_src>
import functools

import jax
import jax.numpy as jnp
from jax.experimental import pallas as pl
from jax.experimental.pallas import tpu as pltpu


_MIN_PALLAS_ELEMS = 64 * 1024     # below this many output elems, use fused XLA
_MIN_PALLAS_BATCH = 16            # tiny batches: XLA fallback (tiles too small)
_TARGET_TILE_ELEMS = 256 * 1024   # grow lane tile until a full-B column tile has this many elems
_MAX_TD = 512                     # lane-tile cap: keeps compaction matmul memory-bound


@functools.lru_cache(maxsize=None)
def _vmem_limit_bytes() -> int:
    """Per-chip scoped-VMEM limit: ~half of physical VMEM, capped at 96 MiB."""
    try:
        cap = int(pltpu.get_tpu_info().vmem_capacity_bytes)
    except Exception:
        cap = 64 * 1024 * 1024          # conservative (v7x-sized) default
    return max(32 * 1024 * 1024, min(cap // 2, 96 * 1024 * 1024))


def _sublane_multiple(dtype) -> int:
    """Dtype-aware sublane rounding (packed dtypes need 16/32-row multiples)."""
    bits = jnp.dtype(dtype).itemsize * 8
    if bits >= 32:
        return 8
    if bits >= 16:
        return 16
    return 32


def _compaction_matrix(td: int, dtype=jnp.float32) -> jax.Array:
    """S[k, d] = 1 iff k // 3 == d; collapses groups of 3 lanes via one matmul."""
    rows = jnp.arange(3 * td, dtype=jnp.int32) // 3
    cols = jnp.arange(td, dtype=jnp.int32)
    return (rows[:, None] == cols[None, :]).astype(dtype)


def _choose_tiles(B: int, dv: int, sub: int, elems_cap: int) -> tuple[int, int]:
    # Lane tile over the feature dim.
    if dv <= 128:
        td = dv
    else:
        td = 128
        # Small-B shapes: widen the lane tile (in 128-lane steps) so tiles stay
        # big enough to amortize the ~0.35us/grid-step overhead.  Capped at
        # _MAX_TD lanes to keep the compaction matmul (td/2 flops per v-byte)
        # safely below the MXU roofline on every generation.
        while (td < _MAX_TD and 2 * td <= dv and B * 2 * td <= elems_cap
               and B * td < _TARGET_TILE_ELEMS):
            td *= 2
    # Sublane tile over the batch dim: as large as the VMEM budget allows.
    tb = min(B, max(sub, elems_cap // td))
    if tb < B:
        tb = max(sub, (tb // sub) * sub)
    # v7x megacore: keep >= 4 grid steps so both TensorCores get work
    # (harmless on single-TC v5e/v6e; the split cost is ~1us total).
    while pl.cdiv(B, tb) * pl.cdiv(dv, td) < 4 and tb > sub:
        tb = max(sub, ((tb // 2) // sub) * sub)
    return tb, td


def _make_kernel(n_valid_cols: int, needs_mask: bool):
    def kernel(v_ref, w_ref, s_ref, o_ref):
        f32 = jnp.float32
        # v_ref: (tb, 3*td) interleaved [d0c0, d0c1, d0c2, d1c0, ...]
        # w_ref: (1, 3*td)  same interleave, sublane-broadcast multiply (VPU)
        prod = v_ref[...].astype(f32) * w_ref[...].astype(f32)
        if needs_mask:
            # Last feature tile overruns 3*dv: zero the out-of-bounds columns so
            # stale VMEM contents can never leak into (or NaN-poison) the matmul.
            j = pl.program_id(1)
            col = jax.lax.broadcasted_iota(jnp.int32, prod.shape, 1) + j * prod.shape[1]
            prod = jnp.where(col < n_valid_cols, prod, 0.0)
        # Collapse groups of 3 lanes: out[:, d] = sum_c prod[:, 3d+c]   (MXU).
        o_ref[...] = jnp.dot(prod, s_ref[...],
                             preferred_element_type=f32).astype(o_ref.dtype)
    return kernel


def _dirproj_pallas(v_flat: jax.Array, w_flat: jax.Array, out_dtype) -> jax.Array:
    B, three_dv = v_flat.shape
    dv = three_dv // 3
    vmem_limit = _vmem_limit_bytes()
    in_item = jnp.dtype(v_flat.dtype).itemsize
    out_item = jnp.dtype(out_dtype).itemsize
    # ~half the scoped VMEM for the double-buffered (v-in + out) tiles.
    elems_cap = max(8 * 128, (vmem_limit // 2) // (2 * (3 * in_item + out_item)))
    sub = _sublane_multiple(v_flat.dtype)
    tb, td = _choose_tiles(B, dv, sub, elems_cap)
    grid = (pl.cdiv(B, tb), pl.cdiv(dv, td))           # batch outer, features inner
    sel = _compaction_matrix(td)                       # shared by every tile
    kernel = _make_kernel(3 * dv, needs_mask=(dv % td != 0))
    return pl.pallas_call(
        kernel,
        out_shape=jax.ShapeDtypeStruct((B, dv), out_dtype),
        grid=grid,
        in_specs=[
            pl.BlockSpec((tb, 3 * td), lambda i, j: (i, j)),    # v (flat, interleaved)
            pl.BlockSpec((1, 3 * td), lambda i, j: (0, j)),     # w (flat, tiny)
            pl.BlockSpec((3 * td, td), lambda i, j: (0, 0)),    # constant compaction matrix
        ],
        out_specs=pl.BlockSpec((tb, td), lambda i, j: (i, j)),
        compiler_params=pltpu.CompilerParams(
            dimension_semantics=("parallel", "parallel"),
            vmem_limit_bytes=vmem_limit,
        ),
    )(v_flat, w_flat, sel)


def direction_proj_vector(v: jax.Array, w: jax.Array) -> jax.Array:
    """(v * w[None]).sum(-1) for v: (B, d_v, 3), w: (d_v, 3) -> (B, d_v)."""
    B, d_v, three = v.shape
    assert three == 3 and w.shape == (d_v, 3)
    if B * d_v < _MIN_PALLAS_ELEMS or B < _MIN_PALLAS_BATCH:
        # Tiny workload: pallas_call launch/step overhead dominates; let XLA fuse.
        return jnp.sum(v * w[None, :, :], axis=-1)

    # Contiguous flat views of the torch-layout tensors (no transpose pass).
    v_flat = v.reshape(B, 3 * d_v)
    w_flat = w.reshape(1, 3 * d_v)

    # Lane folding for narrow feature dims: pack `rep` consecutive batch rows
    # into one kernel row so the output tile stays lane-dense.
    rep = 1
    if d_v < 128:
        while 2 * rep * d_v <= 512 and B % (2 * rep) == 0:
            rep *= 2
    if rep > 1:
        v_flat = v_flat.reshape(B // rep, 3 * d_v * rep)
        w_flat = jnp.tile(w_flat, (1, rep))

    out = _dirproj_pallas(v_flat, w_flat, v.dtype)
    return out.reshape(B, d_v) if rep > 1 else out


class DirectionProjVector:
    """JAX/Pallas port of the PyTorch module (forward pass only)."""

    def __init__(self, d_v: int, d_f: int, *, key=None):
        del d_f  # unused, mirrors the torch signature
        self.emb_dim = d_v
        key = jax.random.PRNGKey(0) if key is None else key
        self.w = jax.random.normal(key, (d_v, 3), dtype=jnp.float32)

    def __call__(self, v: jax.Array) -> jax.Array:
        return direction_proj_vector(v, self.w)


if __name__ == "__main__":
    key = jax.random.PRNGKey(0)
    k = jax.random.split(key, 6)

    fwd = jax.jit(direction_proj_vector)

    def ref(v, w):
        return jnp.sum(v * w[None, :, :], axis=-1)

    # 1) Small torch-like shape through the module wrapper (fused-XLA fast path).
    mod = DirectionProjVector(d_v=32, d_f=16, key=k[0])
    v0 = jax.random.normal(k[1], (2, 32, 3), dtype=jnp.float32)
    out0 = mod(v0)

    # 2) Moderate shape exercising the Pallas kernel (128-lane-multiple tiles,
    #    >= 4 parallel grid steps).
    v1 = jax.random.normal(k[2], (512, 256, 3), dtype=jnp.float32)
    w1 = jax.random.normal(k[3], (256, 3), dtype=jnp.float32)
    out1 = fwd(v1, w1)

    # 3) Narrow feature dim + non-dividing lane tile: exercises the lane
    #    folding (48 -> 384 lanes) and the in-kernel edge masking.
    v2 = jax.random.normal(k[4], (1536, 48, 3), dtype=jnp.float32)
    w2 = jax.random.normal(k[5], (48, 3), dtype=jnp.float32)
    out2 = fwd(v2, w2)

    jax.block_until_ready((out0, out1, out2))

    assert out0.shape == (2, 32)
    assert out1.shape == (512, 256)
    assert out2.shape == (1536, 48)
    assert jnp.allclose(out0, ref(v0, mod.w), atol=1e-5, rtol=1e-5)
    assert jnp.allclose(out1, ref(v1, w1), atol=1e-5, rtol=1e-5)
    assert jnp.allclose(out2, ref(v2, w2), atol=1e-5, rtol=1e-5)
    print("KERNEL_OK")
</pallas_src>

<mosaic_0001>
module attributes {stable_mosaic.version = 11 : i64} {
  func.func @kernel(%arg0: i32, %arg1: i32, %arg2: memref<128x768xf32, #tpu.memory_space<vmem>>, %arg3: memref<1x768xf32, #tpu.memory_space<vmem>>, %arg4: memref<768x256xf32, #tpu.memory_space<vmem>>, %arg5: memref<128x256xf32, #tpu.memory_space<vmem>>) attributes {dimension_semantics = [#tpu.dimension_semantics<parallel>, #tpu.dimension_semantics<parallel>], iteration_bounds = array<i64: 4, 1>, scalar_prefetch = 0 : i64, scratch_operands = 0 : i64, tpu.core_type = #tpu.core_type<tc>, window_params = [{transform_indices = @transform_0, window_bounds = array<i64: 128, 768>}, {transform_indices = @transform_1, window_bounds = array<i64: 1, 768>}, {pipeline_mode = #tpu.pipeline_mode<synchronous>, transform_indices = @transform_2, window_bounds = array<i64: 768, 256>}, {transform_indices = @transform_3, window_bounds = array<i64: 128, 256>}]} {
    %c0 = arith.constant 0 : index
    %c0_0 = arith.constant 0 : index
    %0 = vector.load %arg2[%c0, %c0_0] : memref<128x768xf32, #tpu.memory_space<vmem>>, vector<128x768xf32>
    %c0_1 = arith.constant 0 : index
    %c0_2 = arith.constant 0 : index
    %1 = vector.load %arg3[%c0_1, %c0_2] : memref<1x768xf32, #tpu.memory_space<vmem>>, vector<1x768xf32>
    %2 = vector.broadcast %1 : vector<1x768xf32> to vector<128x768xf32>
    %3 = arith.mulf %0, %2 : vector<128x768xf32>
    %c0_3 = arith.constant 0 : index
    %c0_4 = arith.constant 0 : index
    %4 = vector.load %arg4[%c0_3, %c0_4] : memref<768x256xf32, #tpu.memory_space<vmem>>, vector<768x256xf32>
    %cst = arith.constant dense<0.000000e+00> : vector<128x256xf32>
    %5 = tpu.matmul %3, %4, %cst {dimension_numbers = #tpu.dot_dimension_numbers<[1], [0], [0], [1], [0, 0, 1, 1], [], []>} : vector<128x768xf32>, vector<768x256xf32>, vector<128x256xf32> -> vector<128x256xf32>
    %c0_5 = arith.constant 0 : index
    %c0_6 = arith.constant 0 : index
    %6 = vector.load %arg5[%c0_5, %c0_6] : memref<128x256xf32, #tpu.memory_space<vmem>>, vector<128x256xf32>
    tpu.vector_store %arg5[%c0_5, %c0_6], %5 {strides = array<i32>} : memref<128x256xf32, #tpu.memory_space<vmem>>, vector<128x256xf32>,
    return
  }
  func.func @transform_0(%arg0: i32, %arg1: i32) -> (i32, i32) {
    %c0_i32 = arith.constant 0 : i32
    return %arg0, %arg1 : i32, i32
  }
  func.func @transform_1(%arg0: i32, %arg1: i32) -> (i32, i32) {
    %c0_i32 = arith.constant 0 : i32
    %c0_i32_0 = arith.constant 0 : i32
    return %c0_i32, %arg1 : i32, i32
  }
  func.func @transform_2(%arg0: i32, %arg1: i32) -> (i32, i32) {
    %c0_i32 = arith.constant 0 : i32
    %c0_i32_0 = arith.constant 0 : i32
    %c0_i32_1 = arith.constant 0 : i32
    return %c0_i32, %c0_i32_0 : i32, i32
  }
  func.func @transform_3(%arg0: i32, %arg1: i32) -> (i32, i32) {
    %c0_i32 = arith.constant 0 : i32
    return %arg0, %arg1 : i32, i32
  }
}

</mosaic_0001>

<bundles_post_ra>
// kernel: direction_proj_vector.1
= control target key start
LH: loop header
LB: loop body
LE: loop exit
PB: predicated region body
PF: predicated region fallthrough
CT: control target
= control target key end

     0   :  { %8 = vsyncpa [#allocation3], 0  ;;  %s2800_s0 = inlined_call_operand.vmem [shape: f32[512,768], index: 0, kind: input, shape index: {}]   ;;  %s2801_s1 = inlined_call_operand.vmem [shape: f32[1,768], index: 1, kind: input, shape index: {}]   ;;  %s2802_s2 = inlined_call_operand.vmem [shape: f32[768,256], index: 2, kind: input, shape index: {}]   ;;  %s2803_s3 = inlined_call_operand.hbm [shape: f32[512,256], index: 3, kind: output, shape index: {}]  }
   0x1   :  { %10 = vsyncpa [#allocation3 + $0x1], 0  ;;  %s1504_s12 = smov 0   ;;  %s1506_s13 = smov 0  }
   0x2   :  { %s1508_s14 = smov 0   ;;  %s1510_s15 = smov 0  }
   0x3   :  { %s1512_s16 = smov 0   ;;  %s1514_s17 = smov 0  }
   0x4 LB: > { %s1264_s18 = sadd.s32 4294967295, %s1479_s17   ;;  %s1265_s19 = sadd.s32 4294967294, %s1479_s17   ;;  %s1479_s17 = sphi %s1514_s17, %s16_s17   ;;  %s1475_s16 = sphi %s1512_s16, %s2847_s16   ;;  %s1471_s15 = sphi %s1510_s15, %s2846_s15   ;;  %s1467_s14 = sphi %s1508_s14, %s2845_s14   ;;  %s1463_s13 = sphi %s1506_s13, %s2844_s13   ;;  %s1459_s12 = sphi %s1504_s12, %s2843_s12  }
   0x5   : > { %s28_s20 = sadd.s32 1, %s1475_s16  ;;  %s112_s21 = sadd.s32 1, %s1467_s14 }
   0x6   : > { %p30_p0 = scmp.ge.s32.totalorder %s28_s20, 4  ;;  %p122_p1 = scmp.ne.s32.totalorder %s1467_s14, %s1463_s13 }
   0x7   : > { %p123_p2 = scmp.eq.s32.totalorder %s1264_s18, 3  ;;  %p128_p3 = scmp.ne.s32.totalorder %s1463_s13, %s1459_s12 }
   0x8   : > { %s2849_s20 = smov (%p30_p0, %s28_s20), 0  ;;  %p129_p5 = scmp.eq.s32.totalorder %s1265_s19, 3 }
   0x9   : > { %p1544_p4 = por %p123_p2, %p122_p1  ;;  %s107_s23 = ssub.s32 %s1475_s16, %s2849_s20 }
   0xa   : > { %p1269_p6 = scmp.ge.s32.totalorder %s1479_s17, 1  ;;  %p110_p7 = scmp.eq.s32.totalorder %s107_s23, 0 }
   0xb   : > { %p1551_p8 = por %p129_p5, %p128_p3  ;;  %p173_p9 = scmp.lt.s32.totalorder %s1479_s17, 5 }
   0xc   : > { %s1557_s25 = scalar_select %p110_p7, %s1467_s14, %s112_s21  }
   0xd   : > { %p174_p10 = pnand %p1269_p6, %p173_p9 }
   0xf   : > { %177 = sbr.rel (%p174_p10) target bundleno = 422 (0x1a6), region = 32 }
  0x14   : > { %v480_v0 = vld [vmem:[%s2802_s2 + $0xf8] sm:$0xff]  ;;  %v479_v2 = vld [vmem:[%s2802_s2 + $0xf0] sm:$0xff]  ;;  %v478_v4 = vld [vmem:[%s2802_s2 + $0xe8] sm:$0xff]  ;;  %s1271_s21 = sshll.u32 %s1471_s15, 4  ;;  %s203_s8 = sand.u32 1, %s1463_s13  }
  0x15   : > { %v544_v1 = vld [vmem:[%s2802_s2 + $0x2f8] sm:$0xff]  ;;  %641 = vmatprep.subr.mxu0 %v480_v0  ;;  %v543_v3 = vld [vmem:[%s2802_s2 + $0x2f0] sm:$0xff]  ;;  %v542_v5 = vld [vmem:[%s2802_s2 + $0x2e8] sm:$0xff]  ;;  %p1836_p11 = scmp.lt.s32.totalorder %s1271_s21, 63  ;;  %s1270_s9 = sshll.u32 %s203_s8, 8 }
  0x16   : > { %802 = vmatprep.subr.mxu1 %v544_v1  ;;  %642 = vmatpush1.msra.mxu0 %v479_v2  ;;  %v477_v6 = vld [vmem:[%s2802_s2 + $0xe0] sm:$0xff]  ;;  %v476_v8 = vld [vmem:[%s2802_s2 + $0xd8] sm:$0xff]  ;;  %v475_v10 = vld [vmem:[%s2802_s2 + $0xd0] sm:$0xff]  ;;  %s2664_s11 = scalar_lea.vmem [#allocation2], %s1270_s9  ;;  %s2755_s27 = scalar_lea.sflag [#allocation3], %s203_s8 }
  0x17   : > { %803 = vmatpush1.msra.mxu1 %v543_v3  ;;  %v541_v7 = vld [vmem:[%s2802_s2 + $0x2e0] sm:$0xff]  ;;  %643 = vmatprep.subr.mxu0 %v478_v4  ;;  %v540_v9 = vld [vmem:[%s2802_s2 + $0x2d8] sm:$0xff]  ;;  %v539_v11 = vld [vmem:[%s2802_s2 + $0x2d0] sm:$0xff]  ;;  %s2851_s21 = smov (!%p1836_p11, %s1271_s21), 63  ;;  %s1173_s18 = sshll.u32 %s2664_s11, 4  ;;  %s2747_s18 = int_to_ptr.vmem [resolvable:$true] %s1173_s18 }
  0x18   : > { %804 = vmatprep.subr.mxu1 %v542_v5  ;;  %644 = vmatpush1.msra.mxu0 %v477_v6  ;;  %v474_v12 = vld [vmem:[%s2802_s2 + $0xc8] sm:$0xff]  ;;  %v473_v14 = vld [vmem:[%s2802_s2 + $0xc0] sm:$0xff]  ;;  %v472_v16 = vld [vmem:[%s2802_s2 + $0xb8] sm:$0xff]  ;;  %s1345_s23 = smul.u32 48, %s2851_s21  ;;  %s1403_s29 = scalar_lea.vmem %s2747_s18, 4096 }
  0x19   : > { %805 = vmatpush1.msra.mxu1 %v541_v7  ;;  %v538_v13 = vld [vmem:[%s2802_s2 + $0x2c8] sm:$0xff]  ;;  %645 = vmatprep.subr.mxu0 %v476_v8  ;;  %v537_v15 = vld [vmem:[%s2802_s2 + $0x2c0] sm:$0xff]  ;;  %v536_v17 = vld [vmem:[%s2802_s2 + $0x2b8] sm:$0xff]  ;;  %p1404_p12 = scmp.ne.s32.totalorder %s2747_s18, %s1403_s29  ;;  %s1481_s30 = smov [#allocation2]  }
  0x1a   : > { %806 = vmatprep.subr.mxu1 %v540_v9  ;;  %646 = vmatpush1.msra.mxu0 %v475_v10  ;;  %v471_v18 = vld [vmem:[%s2802_s2 + $0xb0] sm:$0xff]  ;;  %v470_v20 = vld [vmem:[%s2802_s2 + $0xa8] sm:$0xff]  ;;  %v469_v22 = vld [vmem:[%s2802_s2 + $0xa0] sm:$0xff]  ;;  %v323_v10 = vlaneseq  ;;  %s1935_s28 = scalar_lea.vmem %s2800_s0, %s1345_s23  ;;  %s1407_s10 = sshll.u32 %s1481_s30, 4  ;;  %s1408_s10 = int_to_ptr.vmem [resolvable:$false] %s1407_s10 }
  0x1b   : > { %807 = vmatpush1.msra.mxu1 %v539_v11  ;;  %647 = vmatprep.subr.mxu0 %v474_v12  ;;  %v535_v19 = vld [vmem:[%s2802_s2 + $0x2b0] sm:$0xff]  ;;  %v534_v21 = vld [vmem:[%s2802_s2 + $0x2a8] sm:$0xff]  ;;  %v533_v23 = vld [vmem:[%s2802_s2 + $0x2a0] sm:$0xff]  ;;  %p1405_p13 = pnand %p1404_p12, %p1544_p4  ;;  %s1409_s4 = scalar_lea.vmem %s1408_s10, 8192 }
  0x1c   : > { %808 = vmatprep.subr.mxu1 %v538_v13  ;;  %648 = vmatpush1.msra.mxu0 %v473_v14  ;;  %v468_v24 = vld [vmem:[%s2802_s2 + $0x98] sm:$0xff]  ;;  %v467_v26 = vld [vmem:[%s2802_s2 + $0x90] sm:$0xff]  ;;  %v466_v28 = vld [vmem:[%s2802_s2 + $0x88] sm:$0xff]  ;;  %p1410_p1 = scmp.lt.s32.totalorder %s2747_s18, %s1408_s10  ;;  %p1411_p2 = scmp.lt.s32.totalorder %s1409_s4, %s1403_s29 }
  0x1d   : > { %809 = vmatpush1.msra.mxu1 %v537_v15  ;;  %649 = vmatprep.subr.mxu0 %v472_v16  ;;  %v532_v25 = vld [vmem:[%s2802_s2 + $0x298] sm:$0xff]  ;;  %v531_v27 = vld [vmem:[%s2802_s2 + $0x290] sm:$0xff]  ;;  %v530_v29 = vld [vmem:[%s2802_s2 + $0x288] sm:$0xff]  ;;  %p1406_p0 = pneg %p1405_p13 }
  0x1e   : > { %810 = vmatprep.subr.mxu1 %v536_v17  ;;  %650 = vmatpush1.msra.mxu0 %v471_v18  ;;  %v465_v30 = vld [vmem:[%s2802_s2 + $0x80] sm:$0xff]  ;;  %v464_v32 = vld [vmem:[%s2802_s2 + $0x78] sm:$0xff]  ;;  %v463_v34 = vld [vmem:[%s2802_s2 + $0x70] sm:$0xff]  ;;  %p1412_p3 = por %p1411_p2, %p1410_p1 }
  0x1f   : > { %811 = vmatpush1.msra.mxu1 %v535_v19  ;;  %651 = vmatprep.subr.mxu0 %v470_v20  ;;  %v529_v31 = vld [vmem:[%s2802_s2 + $0x280] sm:$0xff]  ;;  %v528_v33 = vld [vmem:[%s2802_s2 + $0x278] sm:$0xff]  ;;  %v527_v35 = vld [vmem:[%s2802_s2 + $0x270] sm:$0xff]  ;;  %v1805_v19 = vshrl.u32 %v323_v10, 7 }
  0x20   : > { %812 = vmatprep.subr.mxu1 %v534_v21  ;;  %652 = vmatpush1.msra.mxu0 %v469_v22  ;;  %v462_v36 = vld [vmem:[%s2802_s2 + $0x68] sm:$0xff]  ;;  %v461_v38 = vld [vmem:[%s2802_s2 + $0x60] sm:$0xff]  ;;  %v460_v40 = vld [vmem:[%s2802_s2 + $0x58] sm:$0xff]  ;;  %p1413_p5 = pnand %p1412_p3, %p1406_p0 }
  0x21   : > { %813 = vmatpush1.msra.mxu1 %v533_v23  ;;  %653 = vmatprep.subr.mxu0 %v468_v24  ;;  %v526_v37 = vld [vmem:[%s2802_s2 + $0x268] sm:$0xff]  ;;  %v525_v39 = vld [vmem:[%s2802_s2 + $0x260] sm:$0xff]  ;;  %v524_v41 = vld [vmem:[%s2802_s2 + $0x258] sm:$0xff]  ;;  %v345_v24 = vsub.s32 5, %v1805_v19 }
  0x22   : > { %814 = vmatprep.subr.mxu1 %v532_v25  ;;  %654 = vmatpush1.msra.mxu0 %v467_v26  ;;  %v459_v42 = vld [vmem:[%s2802_s2 + $0x50] sm:$0xff]  ;;  %v458_v44 = vld [vmem:[%s2802_s2 + $0x48] sm:$0xff]  ;;  %v457_v46 = vld [vmem:[%s2802_s2 + $0x40] sm:$0xff]  ;;  %v341_v25 = vsub.s32 4, %v1805_v19 }
  0x23   : > { %815 = vmatpush1.msra.mxu1 %v531_v27  ;;  %655 = vmatprep.subr.mxu0 %v466_v28  ;;  %v523_v43 = vld [vmem:[%s2802_s2 + $0x250] sm:$0xff]  ;;  %v522_v45 = vld [vmem:[%s2802_s2 + $0x248] sm:$0xff]  ;;  %v521_v47 = vld [vmem:[%s2802_s2 + $0x240] sm:$0xff] }
  0x24   : > { %816 = vmatprep.subr.mxu1 %v530_v29  ;;  %656 = vmatpush1.msra.mxu0 %v465_v30  ;;  %v456_v48 = vld [vmem:[%s2802_s2 + $0x38] sm:$0xff]  ;;  %v455_v50 = vld [vmem:[%s2802_s2 + $0x30] sm:$0xff]  ;;  %v454_v52 = vld [vmem:[%s2802_s2 + $0x28] sm:$0xff] }
  0x25   : > { %817 = vmatpush1.msra.mxu1 %v529_v31  ;;  %657 = vmatprep.subr.mxu0 %v464_v32  ;;  %v520_v49 = vld [vmem:[%s2802_s2 + $0x238] sm:$0xff]  ;;  %v519_v51 = vld [vmem:[%s2802_s2 + $0x230] sm:$0xff]  ;;  %v518_v53 = vld [vmem:[%s2802_s2 + $0x228] sm:$0xff] }
  0x26   : > { %818 = vmatprep.subr.mxu1 %v528_v33  ;;  %658 = vmatpush1.msra.mxu0 %v463_v34  ;;  %v453_v54 = vld [vmem:[%s2802_s2 + $0x20] sm:$0xff]  ;;  %v452_v56 = vld [vmem:[%s2802_s2 + $0x18] sm:$0xff]  ;;  %v451_v58 = vld [vmem:[%s2802_s2 + $0x10] sm:$0xff] }
  0x27   : > { %819 = vmatpush1.msra.mxu1 %v527_v35  ;;  %659 = vmatprep.subr.mxu0 %v462_v36  ;;  %v517_v55 = vld [vmem:[%s2802_s2 + $0x220] sm:$0xff]  ;;  %v516_v57 = vld [vmem:[%s2802_s2 + $0x218] sm:$0xff]  ;;  %v515_v59 = vld [vmem:[%s2802_s2 + $0x210] sm:$0xff] }
  0x28   : > { %820 = vmatprep.subr.mxu1 %v526_v37  ;;  %660 = vmatpush1.msra.mxu0 %v461_v38  ;;  %v450_v60 = vld [vmem:[%s2802_s2 + $0x8] sm:$0xff]  ;;  %v449_v62 = vld [vmem:[%s2802_s2] sm:$0xff]  ;;  %v512_v0 = vld [vmem:[%s2802_s2 + $0x1f8] sm:$0xff] }
  0x29   : > { %821 = vmatpush1.msra.mxu1 %v525_v39  ;;  %661 = vmatprep.subr.mxu0 %v460_v40  ;;  %v514_v61 = vld [vmem:[%s2802_s2 + $0x208] sm:$0xff]  ;;  %v513_v63 = vld [vmem:[%s2802_s2 + $0x200] sm:$0xff]  ;;  %v576_v1 = vld [vmem:[%s2802_s2 + $0x3f8] sm:$0xff] }
  0x2a   : > { %822 = vmatprep.subr.mxu1 %v524_v41  ;;  %662 = vmatpush1.msra.mxu0 %v459_v42  ;;  %v511_v2 = vld [vmem:[%s2802_s2 + $0x1f0] sm:$0xff]  ;;  %v510_v4 = vld [vmem:[%s2802_s2 + $0x1e8] sm:$0xff]  ;;  %v509_v6 = vld [vmem:[%s2802_s2 + $0x1e0] sm:$0xff] }
  0x2b   : > { %823 = vmatpush1.msra.mxu1 %v523_v43  ;;  %663 = vmatprep.subr.mxu0 %v458_v44  ;;  %v575_v3 = vld [vmem:[%s2802_s2 + $0x3f0] sm:$0xff]  ;;  %v574_v5 = vld [vmem:[%s2802_s2 + $0x3e8] sm:$0xff]  ;;  %v573_v7 = vld [vmem:[%s2802_s2 + $0x3e0] sm:$0xff] }
  0x2c   : > { %824 = vmatprep.subr.mxu1 %v522_v45  ;;  %664 = vmatpush1.msra.mxu0 %v457_v46  ;;  %v508_v8 = vld [vmem:[%s2802_s2 + $0x1d8] sm:$0xff]  ;;  %v507_v11 = vld [vmem:[%s2802_s2 + $0x1d0] sm:$0xff]  ;;  %v506_v13 = vld [vmem:[%s2802_s2 + $0x1c8] sm:$0xff] }
  0x2d   : > { %825 = vmatpush1.msra.mxu1 %v521_v47  ;;  %665 = vmatprep.subr.mxu0 %v456_v48  ;;  %v572_v9 = vld [vmem:[%s2802_s2 + $0x3d8] sm:$0xff]  ;;  %v571_v12 = vld [vmem:[%s2802_s2 + $0x3d0] sm:$0xff]  ;;  %v570_v14 = vld [vmem:[%s2802_s2 + $0x3c8] sm:$0xff] }
  0x2e   : > { %826 = vmatprep.subr.mxu1 %v520_v49  ;;  %666 = vmatpush1.msra.mxu0 %v455_v50  ;;  %v505_v15 = vld [vmem:[%s2802_s2 + $0x1c0] sm:$0xff]  ;;  %v504_v17 = vld [vmem:[%s2802_s2 + $0x1b8] sm:$0xff]  ;;  %v503_v20 = vld [vmem:[%s2802_s2 + $0x1b0] sm:$0xff] }
  0x2f   : > { %827 = vmatpush1.msra.mxu1 %v519_v51  ;;  %667 = vmatprep.subr.mxu0 %v454_v52  ;;  %v569_v16 = vld [vmem:[%s2802_s2 + $0x3c0] sm:$0xff]  ;;  %v568_v18 = vld [vmem:[%s2802_s2 + $0x3b8] sm:$0xff]  ;;  %v567_v21 = vld [vmem:[%s2802_s2 + $0x3b0] sm:$0xff] }
  0x30   : > { %828 = vmatprep.subr.mxu1 %v518_v53  ;;  %668 = vmatpush1.msra.mxu0 %v453_v54  ;;  %v502_v22 = vld [vmem:[%s2802_s2 + $0x1a8] sm:$0xff]  ;;  %v501_v26 = vld [vmem:[%s2802_s2 + $0x1a0] sm:$0xff]  ;;  %v500_v28 = vld [vmem:[%s2802_s2 + $0x198] sm:$0xff]  ;;  %v329_v53 = vsub.s32 1, %v1805_v19 }
  0x31   : > { %829 = vmatpush1.msra.mxu1 %v517_v55  ;;  %669 = vmatprep.subr.mxu0 %v452_v56  ;;  %v566_v23 = vld [vmem:[%s2802_s2 + $0x3a8] sm:$0xff]  ;;  %v565_v27 = vld [vmem:[%s2802_s2 + $0x3a0] sm:$0xff]  ;;  %v564_v29 = vld [vmem:[%s2802_s2 + $0x398] sm:$0xff]  ;;  %v337_v56 = vsub.s32 3, %v1805_v19 }
  0x32   : > { %830 = vmatprep.subr.mxu1 %v516_v57  ;;  %670 = vmatpush1.msra.mxu0 %v451_v58  ;;  %v499_v30 = vld [vmem:[%s2802_s2 + $0x190] sm:$0xff]  ;;  %v1849_v32 = vld [vmem:[%s2801_s1] sm:$0x3f]  ;;  %v498_v33 = vld [vmem:[%s2802_s2 + $0x188] sm:$0xff] }
  0x33   : > { %831 = vmatpush1.msra.mxu1 %v515_v59  ;;  %671 = vmatprep.subr.mxu0 %v450_v60  ;;  %v563_v31 = vld [vmem:[%s2802_s2 + $0x390] sm:$0xff]  ;;  %v562_v34 = vld [vmem:[%s2802_s2 + $0x388] sm:$0xff]  ;;  %v1858_v35 = vrot.slane %v1849_v32, %v345_v24  ;;  %v1861_v36 = vrot.slane %v1849_v32, %v341_v25  ;;  %v497_v37 = vld [vmem:[%s2802_s2 + $0x180] sm:$0xff]  ;;  %v325_v59 = vsub.s32 0, %v1805_v19  ;;  %v333_v60 = vsub.s32 2, %v1805_v19 }
  0x34   : > { %832 = vmatprep.subr.mxu1 %v514_v61  ;;  %672 = vmatpush1.msra.mxu0 %v449_v62  ;;  %v561_v38 = vld [vmem:[%s2802_s2 + $0x380] sm:$0xff]  ;;  %v496_v39 = vld [vmem:[%s2802_s2 + $0x178] sm:$0xff]  ;;  %v495_v41 = vld [vmem:[%s2802_s2 + $0x170] sm:$0xff] }
  0x35   : > { %833 = vmatpush1.msra.mxu1 %v513_v63  ;;  %673 = vmatprep.subr.mxu0 %v512_v0  ;;  %v560_v40 = vld [vmem:[%s2802_s2 + $0x378] sm:$0xff]  ;;  %v559_v42 = vld [vmem:[%s2802_s2 + $0x370] sm:$0xff]  ;;  %v494_v43 = vld [vmem:[%s2802_s2 + $0x168] sm:$0xff]  ;;  %v1975_v10 = vrot.slane %v1849_v32, %v325_v59 }
  0x36   : > { %834 = vmatprep.subr.mxu1 %v576_v1  ;;  %674 = vmatpush2.msra.mxu0 %v511_v2  ;;  %v558_v44 = vld [vmem:[%s2802_s2 + $0x368] sm:$0xff]  ;;  %v493_v45 = vld [vmem:[%s2802_s2 + $0x160] sm:$0xff]  ;;  %v492_v47 = vld [vmem:[%s2802_s2 + $0x158] sm:$0xff]  ;;  %v1955_v2 = vrot.slane %v1849_v32, %v329_v53 }
  0x37   : > { %835 = vmatpush2.msra.mxu1 %v575_v3  ;;  %675 = vmatprep.subr.mxu0 %v510_v4  ;;  %v557_v46 = vld [vmem:[%s2802_s2 + $0x360] sm:$0xff]  ;;  %v556_v48 = vld [vmem:[%s2802_s2 + $0x358] sm:$0xff]  ;;  %v491_v49 = vld [vmem:[%s2802_s2 + $0x150] sm:$0xff] }
  0x38   : > { %836 = vmatprep.subr.mxu1 %v574_v5  ;;  %676 = vmatpush2.msra.mxu0 %v509_v6  ;;  %v555_v50 = vld [vmem:[%s2802_s2 + $0x350] sm:$0xff]  ;;  %v490_v51 = vld [vmem:[%s2802_s2 + $0x148] sm:$0xff]  ;;  %v489_v54 = vld [vmem:[%s2802_s2 + $0x140] sm:$0xff]  ;;  %v1965_v6 = vrot.slane %v1849_v32, %v337_v56 }
  0x39   : > { %837 = vmatpush2.msra.mxu1 %v573_v7  ;;  %677 = vmatprep.subr.mxu0 %v508_v8  ;;  %v554_v52 = vld [vmem:[%s2802_s2 + $0x348] sm:$0xff]  ;;  %v553_v55 = vld [vmem:[%s2802_s2 + $0x340] sm:$0xff]  ;;  %v488_v57 = vld [vmem:[%s2802_s2 + $0x138] sm:$0xff] }
  0x3a   : > { %838 = vmatprep.subr.mxu1 %v572_v9  ;;  %678 = vmatpush2.msra.mxu0 %v507_v11  ;;  %v552_v58 = vld [vmem:[%s2802_s2 + $0x338] sm:$0xff]  ;;  %v487_v61 = vld [vmem:[%s2802_s2 + $0x130] sm:$0xff]  ;;  %v486_v63 = vld [vmem:[%s2802_s2 + $0x128] sm:$0xff]  ;;  %v1978_v11 = vrot.slane %v1849_v32, %v333_v60 }
  0x3b   : > { %839 = vmatpush2.msra.mxu1 %v571_v12  ;;  %679 = vmatprep.subr.mxu0 %v506_v13  ;;  %v551_v62 = vld [vmem:[%s2802_s2 + $0x330] sm:$0xff]  ;;  %v550_v0 = vld [vmem:[%s2802_s2 + $0x328] sm:$0xff]  ;;  %v485_v1 = vld [vmem:[%s2802_s2 + $0x120] sm:$0xff] }
  0x3c   : > { %840 = vmatprep.subr.mxu1 %v570_v14  ;;  %680 = vmatpush2.msra.mxu0 %v505_v15  ;;  %v549_v3 = vld [vmem:[%s2802_s2 + $0x320] sm:$0xff]  ;;  %v484_v4 = vld [vmem:[%s2802_s2 + $0x118] sm:$0xff]  ;;  %v226_v5 = vld [vmem:[%s1935_s28 + $0x8] sm:$0xff] }
  0x3d   : > { %841 = vmatpush2.msra.mxu1 %v569_v16  ;;  %681 = vmatprep.subr.mxu0 %v504_v17  ;;  %v548_v7 = vld [vmem:[%s2802_s2 + $0x318] sm:$0xff]  ;;  %v483_v8 = vld [vmem:[%s2802_s2 + $0x110] sm:$0xff]  ;;  %v225_v13 = vld [vmem:[%s1935_s28] sm:$0xff]  ;;  %v354_v17 = vmul.f32 %v1955_v2, %v226_v5 }
  0x3e   : > { %842 = vmatprep.subr.mxu1 %v568_v18  ;;  %682 = vmatpush2.msra.mxu0 %v503_v20  ;;  %v228_v9 = vld [vmem:[%s1935_s28 + $0x18] sm:$0xff]  ;;  %v547_v12 = vld [vmem:[%s2802_s2 + $0x310] sm:$0xff]  ;;  %v482_v15 = vld [vmem:[%s2802_s2 + $0x108] sm:$0xff] }
  0x3f   : > { %843 = vmatpush2.msra.mxu1 %v567_v21  ;;  %683 = vmatprep.subr.mxu0 %v502_v22  ;;  %v227_v14 = vld [vmem:[%s1935_s28 + $0x10] sm:$0xff]  ;;  %v546_v16 = vld [vmem:[%s2802_s2 + $0x308] sm:$0xff]  ;;  %v481_v18 = vld [vmem:[%s2802_s2 + $0x100] sm:$0xff]  ;;  %v356_v19 = vmul.f32 %v1965_v6, %v228_v9  ;;  %v353_v21 = vmul.f32 %v1975_v10, %v225_v13 }
  0x40   : > { %844 = vmatprep.subr.mxu1 %v566_v23  ;;  %684 = vmatpush2.msra.mxu0 %v501_v26  ;;  %v545_v20 = vld [vmem:[%s2802_s2 + $0x300] sm:$0xff]  ;;  %v355_v22 = vmul.f32 %v1978_v11, %v227_v14  ;;  %v232_v23 = vld [vmem:[%s1935_s28 + $0x38] sm:$0xff]  ;;  %v234_v24 = vld [vmem:[%s1935_s28 + $0x48] sm:$0xff] }
  0x41   : > { %845 = vmatpush2.msra.mxu1 %v565_v27  ;;  %685 = vmatprep.subr.mxu0 %v500_v28  ;;  %v608_v25 = vld [vmem:[%s2802_s2 + $0x4f8] sm:$0xff]  ;;  %v607_v26 = vld [vmem:[%s2802_s2 + $0x4f0] sm:$0xff]  ;;  %v233_v28 = vld [vmem:[%s1935_s28 + $0x40] sm:$0xff] }
  0x42   : > { %846 = vmatprep.subr.mxu1 %v564_v29  ;;  %686 = vmatpush2.msra.mxu0 %v499_v30  ;;  %v231_v27 = vld [vmem:[%s1935_s28 + $0x30] sm:$0xff]  ;;  %v606_v29 = vld [vmem:[%s2802_s2 + $0x4e8] sm:$0xff]  ;;  %v360_v30 = vmul.f32 %v1955_v2, %v232_v23  ;;  %v605_v32 = vld [vmem:[%s2802_s2 + $0x4e0] sm:$0xff] }
  0x43   : > { %847 = vmatpush2.msra.mxu1 %v563_v31  ;;  %687 = vmatprep.subr.mxu0 %v498_v33  ;;  %v362_v31 = vmul.f32 %v1965_v6, %v234_v24  ;;  %v359_v33 = vmul.f32 %v1975_v10, %v231_v27  ;;  %v293_v53 = vld [vmem:[%s1935_s28 + $0x220] sm:$0xff]  ;;  %v244_v56 = vld [vmem:[%s1935_s28 + $0x98] sm:$0xff]  ;;  %v298_v59 = vld [vmem:[%s1935_s28 + $0x248] sm:$0xff] }
  0x44   : > { %848 = vmatprep.subr.mxu1 %v562_v34  ;;  %688 = vmatpush2.msra.mxu0 %v497_v37  ;;  %v361_v34 = vmul.f32 %v1978_v11, %v233_v28  ;;  %v238_v37 = vld [vmem:[%s1935_s28 + $0x68] sm:$0xff]  ;;  %v599_v60 = vld [vmem:[%s2802_s2 + $0x4b0] sm:$0xff]  ;;  %v372_v9 = vmul.f32 %v1955_v2, %v244_v56  ;;  %v304_v14 = vld [vmem:[%s1935_s28 + $0x278] sm:$0xff] }
  0x45   : > { %849 = vmatpush2.msra.mxu1 %v561_v38  ;;  %689 = vmatprep.subr.mxu0 %v496_v39  ;;  %v240_v38 = vld [vmem:[%s1935_s28 + $0x78] sm:$0xff]  ;;  %v249_v23 = vld [vmem:[%s1935_s28 + $0xc0] sm:$0xff]  ;;  %v251_v24 = vld [vmem:[%s1935_s28 + $0xd0] sm:$0xff] }
  0x46   : > { %850 = vmatprep.subr.mxu1 %v560_v40  ;;  %690 = vmatpush2.msra.mxu0 %v495_v41  ;;  %v604_v39 = vld [vmem:[%s2802_s2 + $0x4d8] sm:$0xff]  ;;  %v237_v40 = vld [vmem:[%s1935_s28 + $0x60] sm:$0xff]  ;;  %v603_v41 = vld [vmem:[%s2802_s2 + $0x4d0] sm:$0xff] }
  0x47   : > { %851 = vmatpush2.msra.mxu1 %v559_v42  ;;  %691 = vmatprep.subr.mxu0 %v494_v43  ;;  %v239_v42 = vld [vmem:[%s1935_s28 + $0x70] sm:$0xff]  ;;  %v602_v43 = vld [vmem:[%s2802_s2 + $0x4c8] sm:$0xff] }
  0x48   : > { %852 = vmatprep.subr.mxu1 %v558_v44  ;;  %692 = vmatpush2.msra.mxu0 %v493_v45  ;;  %v366_v44 = vmul.f32 %v1955_v2, %v238_v37  ;;  %v368_v45 = vmul.f32 %v1965_v6, %v240_v38  ;;  %v595_v37 = vld [vmem:[%s2802_s2 + $0x490] sm:$0xff]  ;;  %v318_v56 = vld [vmem:[%s1935_s28 + $0x2e8] sm:$0xff] }
  0x49   : > { %853 = vmatpush2.msra.mxu1 %v557_v46  ;;  %693 = vmatprep.subr.mxu0 %v492_v47  ;;  %v292_v46 = vld [vmem:[%s1935_s28 + $0x218] sm:$0xff]  ;;  %v294_v47 = vld [vmem:[%s1935_s28 + $0x228] sm:$0xff] }
  0x4a   : > { %854 = vmatprep.subr.mxu1 %v556_v48  ;;  %694 = vmatpush2.msra.mxu0 %v491_v49  ;;  %v601_v48 = vld [vmem:[%s2802_s2 + $0x4c0] sm:$0xff]  ;;  %v365_v49 = vmul.f32 %v1975_v10, %v237_v40 }
  0x4b   : > { %855 = vmatpush2.msra.mxu1 %v555_v50  ;;  %695 = vmatprep.subr.mxu0 %v490_v51  ;;  %v2043_v50 = vmul.f32 %v1955_v2, %v292_v46  ;;  %v2046_v51 = vmul.f32 %v1965_v6, %v294_v47  ;;  %v262_v46 = vld [vmem:[%s1935_s28 + $0x128] sm:$0xff] }
  0x4c   : > { %856 = vmatprep.subr.mxu1 %v554_v52  ;;  %696 = vmatpush2.msra.mxu0 %v489_v54  ;;  %v291_v52 = vld [vmem:[%s1935_s28 + $0x210] sm:$0xff]  ;;  %v367_v54 = vmul.f32 %v1978_v11, %v239_v42  ;;  %v309_v42 = vld [vmem:[%s1935_s28 + $0x2a0] sm:$0xff] }
  0x4d   : > { %857 = vmatpush2.msra.mxu1 %v553_v55  ;;  %697 = vmatprep.subr.mxu0 %v488_v57  ;;  %v600_v55 = vld [vmem:[%s2802_s2 + $0x4b8] sm:$0xff]  ;;  %v2056_v57 = vmul.f32 %v1975_v10, %v291_v52  ;;  %v2138_v47 = vmul.f32 %v1975_v10, %v309_v42  ;;  %v379_v52 = vmul.f32 %v1978_v11, %v251_v24  ;;  %v283_v42 = vld [vmem:[%s1935_s28 + $0x1d0] sm:$0xff] }
  0x4e   : > { %858 = vmatprep.subr.mxu1 %v552_v58  ;;  %698 = vmatpush2.msra.mxu0 %v487_v61  ;;  %v2059_v58 = vmul.f32 %v1978_v11, %v293_v53  ;;  %v246_v61 = vld [vmem:[%s1935_s28 + $0xa8] sm:$0xff] }
  0x4f   : > { %859 = vmatpush2.msra.mxu1 %v551_v62  ;;  %699 = vmatprep.subr.mxu0 %v486_v63  ;;  %v2067_v62 = vmul.f32 %v1955_v2, %v298_v59  ;;  %v300_v63 = vld [vmem:[%s1935_s28 + $0x258] sm:$0xff]  ;;  %v315_v59 = vld [vmem:[%s1935_s28 + $0x2d0] sm:$0xff] }
  0x50   : > { %860 = vmatprep.subr.mxu1 %v550_v0  ;;  %700 = vmatpush2.msra.mxu0 %v485_v1  ;;  %v297_v0 = vld [vmem:[%s1935_s28 + $0x240] sm:$0xff]  ;;  %v598_v1 = vld [vmem:[%s2802_s2 + $0x4a8] sm:$0xff]  ;;  %v2077_v5 = vmul.f32 %v1965_v6, %v300_v63  ;;  %v2161_v63 = vmul.f32 %v1965_v6, %v318_v56  ;;  %v248_v56 = vld [vmem:[%s1935_s28 + $0xb8] sm:$0xff] }
  0x51   : > { %861 = vmatpush2.msra.mxu1 %v549_v3  ;;  %701 = vmatprep.subr.mxu0 %v484_v4  ;;  %v243_v3 = vld [vmem:[%s1935_s28 + $0x90] sm:$0xff]  ;;  %v245_v4 = vld [vmem:[%s1935_s28 + $0xa0] sm:$0xff] }
  0x52   : > { %862 = vmatprep.subr.mxu1 %v548_v7  ;;  %702 = vmatpush2.msra.mxu0 %v483_v8  ;;  %v2080_v7 = vmul.f32 %v1975_v10, %v297_v0  ;;  %v299_v8 = vld [vmem:[%s1935_s28 + $0x250] sm:$0xff]  ;;  %v371_v28 = vmul.f32 %v1975_v10, %v243_v3  ;;  %v2164_v0 = vmul.f32 %v1975_v10, %v315_v59  ;;  %v593_v3 = vld [vmem:[%s2802_s2 + $0x480] sm:$0xff] }
  0x53   : > { %863 = vmatpush2.msra.mxu1 %v547_v12  ;;  %703 = vmatprep.subr.mxu0 %v482_v15  ;;  %v250_v12 = vld [vmem:[%s1935_s28 + $0xc8] sm:$0xff]  ;;  %v2086_v13 = vmul.f32 %v1978_v11, %v299_v8  ;;  %v589_v59 = vld [vmem:[%s2802_s2 + $0x460] sm:$0xff] }
  0x54   : > { %864 = vmatprep.subr.mxu1 %v546_v16  ;;  %704 = vmatpush2.msra.mxu0 %v481_v18  ;;  %v306_v15 = vld [vmem:[%s1935_s28 + $0x288] sm:$0xff]  ;;  %v374_v16 = vmul.f32 %v1965_v6, %v246_v61  ;;  %v252_v18 = vld [vmem:[%s1935_s28 + $0xd8] sm:$0xff] }
  0x55   : > { %705 = vmatprep.mubr.f32.mxu0 %v354_v17  ;;  %865 = vmatpush2.msra.mxu1 %v545_v20  ;;  %v597_v17 = vld [vmem:[%s2802_s2 + $0x4a0] sm:$0xff]  ;;  %v2099_v20 = vmul.f32 %v1965_v6, %v306_v15  ;;  %v380_v38 = vmul.f32 %v1965_v6, %v252_v18  ;;  %v2184_v15 = vmul.f32 %v1955_v2, %v262_v46  ;;  %v278_v18 = vld [vmem:[%s1935_s28 + $0x1a8] sm:$0xff] }
  0x56   : > { %866 = vmatprep.mubr.f32.mxu1 %v356_v19  ;;  %706 = vmatmul.mubr.f32.vlgmr.msra.gmra.mxu0 %v353_v21  ;;  %v2096_v19 = vmul.f32 %v1955_v2, %v304_v14  ;;  %v303_v21 = vld [vmem:[%s1935_s28 + $0x270] sm:$0xff]  ;;  %v592_v14 = vld [vmem:[%s2802_s2 + $0x478] sm:$0xff]  ;;  %v2199_v24 = vmul.f32 %v1858_v35, %v278_v18 }
  0x57   : > { %867 = vmatmul.mubr.f32.vlgmr.msra.gmra.mxu1 %v355_v22  ;;  %963 = vmatprep.subr.mxu0 %v608_v25  ;;  %v305_v22 = vld [vmem:[%s1935_s28 + $0x280] sm:$0xff]  ;;  %v247_v18 = vld [vmem:[%s1935_s28 + $0xb0] sm:$0xff] }
  0x58   : > { %1281 = vmatprep.subr.mxu1 %v608_v25  ;;  %964 = vmatpush1.msra.mxu0 %v607_v26  ;;  %v256_v25 = vld [vmem:[%s1935_s28 + $0xf8] sm:$0xff]  ;;  %v2110_v27 = vmul.f32 %v1978_v11, %v305_v22  ;;  %v277_v22 = vld [vmem:[%s1935_s28 + $0x1a0] sm:$0xff] }
  0x59   : > { %1313 = vmatpush1.msra.mxu1 %v607_v26  ;;  %965 = vmatprep.subr.mxu0 %v606_v29  ;;  %v2107_v26 = vmul.f32 %v1975_v10, %v303_v21  ;;  %v2146_v53 = vmul.f32 %v1955_v2, %v256_v25  ;;  %v229_v21 = vld [vmem:[%s1935_s28 + $0x20] sm:$0xff] }
  0x5a   : > { %1282 = vmatprep.subr.mxu1 %v606_v29  ;;  %711 = vmatprep.mubr.f32.mxu0 %v360_v30  ;;  %v373_v29 = vmul.f32 %v1978_v11, %v245_v4  ;;  %v596_v30 = vld [vmem:[%s2802_s2 + $0x498] sm:$0xff]  ;;  %v2202_v25 = vmul.f32 %v1861_v36, %v229_v21  ;;  %v295_v21 = vld [vmem:[%s1935_s28 + $0x230] sm:$0xff] }
  0x5b   : > { %872 = vmatprep.mubr.f32.mxu1 %v362_v31  ;;  %966 = vmatpush1.msra.mxu0 %v605_v32  ;;  %v378_v31 = vmul.f32 %v1955_v2, %v250_v12  ;;  %v230_v12 = vld [vmem:[%s1935_s28 + $0x28] sm:$0xff] }
  0x5c   : > { %1314 = vmatpush1.msra.mxu1 %v605_v32  ;;  %712 = vmatmul.mubr.f32.gmra.mxu0 %v359_v33  ;;  %v258_v32 = vld [vmem:[%s1935_s28 + $0x108] sm:$0xff] }
  0x5d   : > { %873 = vmatmul.mubr.f32.gmra.mxu1 %v361_v34  ;;  %967 = vmatprep.subr.mxu0 %v604_v39  ;;  %v310_v33 = vld [vmem:[%s1935_s28 + $0x2a8] sm:$0xff]  ;;  %v312_v34 = vld [vmem:[%s1935_s28 + $0x2b8] sm:$0xff]  ;;  %v2158_v61 = vmul.f32 %v1965_v6, %v258_v32  ;;  %v235_v32 = vld [vmem:[%s1935_s28 + $0x50] sm:$0xff] }
  0x5e   : > { %1283 = vmatprep.subr.mxu1 %v604_v39  ;;  %968 = vmatpush1.msra.mxu0 %v603_v41  ;;  %v255_v39 = vld [vmem:[%s1935_s28 + $0xf0] sm:$0xff]  ;;  %v2127_v40 = vmul.f32 %v1955_v2, %v310_v33  ;;  %v590_v33 = vld [vmem:[%s2802_s2 + $0x468] sm:$0xff] }
  0x5f   : > { %1315 = vmatpush1.msra.mxu1 %v603_v41  ;;  %969 = vmatprep.subr.mxu0 %v602_v43  ;;  %v2130_v41 = vmul.f32 %v1965_v6, %v312_v34  ;;  %v2171_v4 = vmul.f32 %v1975_v10, %v255_v39  ;;  %v2220_v39 = vmul.f32 %v1861_v36, %v235_v32  ;;  %v253_v32 = vld [vmem:[%s1935_s28 + $0xe0] sm:$0xff] }
  0x60   : > { %1284 = vmatprep.subr.mxu1 %v602_v43  ;;  %717 = vmatprep.mubr.f32.mxu0 %v366_v44  ;;  %v311_v43 = vld [vmem:[%s1935_s28 + $0x2b0] sm:$0xff]  ;;  %v377_v44 = vmul.f32 %v1975_v10, %v249_v23 }
  0x61   : > { %878 = vmatprep.mubr.f32.mxu1 %v368_v45  ;;  %970 = vmatpush1.msra.mxu0 %v601_v48  ;;  %v257_v45 = vld [vmem:[%s1935_s28 + $0x100] sm:$0xff]  ;;  %v591_v23 = vld [vmem:[%s2802_s2 + $0x470] sm:$0xff] }
  0x62   : > { %1316 = vmatpush1.msra.mxu1 %v601_v48  ;;  %718 = vmatmul.mubr.f32.gmra.mxu0 %v365_v49  ;;  %v2141_v48 = vmul.f32 %v1978_v11, %v311_v43  ;;  %v316_v49 = vld [vmem:[%s1935_s28 + $0x2d8] sm:$0xff]  ;;  %v2174_v8 = vmul.f32 %v1978_v11, %v257_v45  ;;  %v242_v43 = vld [vmem:[%s1935_s28 + $0x88] sm:$0xff] }
  0x63   : > { %879 = vmatmul.mubr.f32.gmra.mxu1 %v367_v54  ;;  %971 = vmatprep.subr.mxu0 %v600_v55  ;;  %v264_v54 = vld [vmem:[%s1935_s28 + $0x138] sm:$0xff]  ;;  %v290_v45 = vld [vmem:[%s1935_s28 + $0x208] sm:$0xff] }
  0x64   : > { %1285 = vmatprep.subr.mxu1 %v600_v55  ;;  %972 = vmatpush1.msra.mxu0 %v599_v60  ;;  %v2150_v55 = vmul.f32 %v1955_v2, %v316_v49  ;;  %v2232_v46 = vmul.f32 %v1858_v35, %v290_v45  ;;  %v241_v49 = vld [vmem:[%s1935_s28 + $0x80] sm:$0xff]  ;;  %v2274_v45 = vmul.f32 %v1861_v36, %v253_v32  ;;  %v259_v32 = vld [vmem:[%s1935_s28 + $0x110] sm:$0xff] }
  0x65   : > { %1317 = vmatpush1.msra.mxu1 %v599_v60  ;;  %973 = vmatprep.subr.mxu0 %v598_v1  ;;  %v594_v60 = vld [vmem:[%s2802_s2 + $0x488] sm:$0xff] }
  0x66   : > { %1286 = vmatprep.subr.mxu1 %v598_v1  ;;  %723 = vmatprep.mubr.f32.mxu0 %v372_v9  ;;  %v317_v1 = vld [vmem:[%s1935_s28 + $0x2e0] sm:$0xff]  ;;  %2808 = vst [vmem:[#allocation6_spill] sm:$0xff] %v2274_v45  ;;  %v266_v45 = vld [vmem:[%s1935_s28 + $0x148] sm:$0xff] }
  0x67   : > { %884 = vmatprep.mubr.f32.mxu1 %v374_v16  ;;  %974 = vmatpush1.msra.mxu0 %v597_v17  ;;  %v2177_v9 = vmul.f32 %v1978_v11, %v317_v1  ;;  %v2187_v16 = vmul.f32 %v1965_v6, %v264_v54  ;;  %v289_v54 = vld [vmem:[%s1935_s28 + $0x200] sm:$0xff] }
  0x68   : > { %1318 = vmatpush1.msra.mxu1 %v597_v17  ;;  %724 = vmatmul.mubr.f32.gmra.mxu0 %v371_v28  ;;  %v2190_v17 = vmul.f32 %v1858_v35, %v230_v12  ;;  %v2205_v28 = vmul.f32 %v1861_v36, %v277_v22  ;;  %v2244_v1 = vmul.f32 %v1861_v36, %v289_v54  ;;  %v296_v12 = vld [vmem:[%s1935_s28 + $0x238] sm:$0xff] }
  0x69   : > { %885 = vmatmul.mubr.f32.gmra.mxu1 %v373_v29  ;;  %975 = vmatprep.subr.mxu0 %v596_v30  ;;  %v236_v29 = vld [vmem:[%s1935_s28 + $0x58] sm:$0xff]  ;;  %v2259_v22 = vmul.f32 %v1861_v36, %v295_v21 }
  0x6a   : > { %1287 = vmatprep.subr.mxu1 %v596_v30  ;;  %976 = vmatpush1.msra.mxu0 %v595_v37  ;;  %v284_v30 = vld [vmem:[%s1935_s28 + $0x1d8] sm:$0xff]  ;;  %v2214_v34 = vmul.f32 %v1858_v35, %v236_v29  ;;  %v254_v29 = vld [vmem:[%s1935_s28 + $0xe8] sm:$0xff] }
  0x6b   : > { %1319 = vmatpush1.msra.mxu1 %v595_v37  ;;  %977 = vmatprep.subr.mxu0 %v594_v60  ;;  %v2217_v37 = vmul.f32 %v1858_v35, %v284_v30  ;;  %v302_v30 = vld [vmem:[%s1935_s28 + $0x268] sm:$0xff]  ;;  %v260_v54 = vld [vmem:[%s1935_s28 + $0x118] sm:$0xff] }
  0x6c   : > { %1288 = vmatprep.subr.mxu1 %v594_v60  ;;  %729 = vmatprep.mubr.f32.mxu0 %v378_v31  ;;  %v2226_v31 = vmul.f32 %v1861_v36, %v283_v42  ;;  %v2241_v60 = vmul.f32 %v1861_v36, %v241_v49  ;;  %v2268_v42 = vmul.f32 %v1858_v35, %v254_v29  ;;  %v301_v49 = vld [vmem:[%s1935_s28 + $0x260] sm:$0xff] }
  0x6d   : > { %890 = vmatprep.mubr.f32.mxu1 %v380_v38  ;;  %978 = vmatpush1.msra.mxu0 %v593_v3  ;;  %v2229_v38 = vmul.f32 %v1858_v35, %v242_v43  ;;  %v2271_v43 = vmul.f32 %v1858_v35, %v302_v30  ;;  %v2285_v21 = vmul.f32 %v1861_v36, %v301_v49 }
  0x6e   : > { %1320 = vmatpush1.msra.mxu1 %v593_v3  ;;  %730 = vmatmul.mubr.f32.gmra.mxu0 %v377_v44  ;;  %v2247_v3 = vmul.f32 %v1858_v35, %v248_v56  ;;  %v2253_v44 = vmul.f32 %v1858_v35, %v296_v12  ;;  %v308_v56 = vld [vmem:[%s1935_s28 + $0x298] sm:$0xff]  ;;  %v261_v12 = vld [vmem:[%s1935_s28 + $0x120] sm:$0xff]  ;;  %v2288_v29 = vmul.f32 %v1858_v35, %v260_v54 }
  0x6f   : > { %891 = vmatmul.mubr.f32.gmra.mxu1 %v379_v52  ;;  %979 = vmatprep.subr.mxu0 %v592_v14  ;;  %v2256_v52 = vmul.f32 %v1861_v36, %v247_v18  ;;  %2807 = vst [vmem:[#allocation5_spill] sm:$0xff] %v2271_v43  ;;  %v263_v18 = vld [vmem:[%s1935_s28 + $0x130] sm:$0xff]  ;;  %2809 = vst [vmem:[#allocation7_spill] sm:$0xff] %v2285_v21  ;;  %v2291_v30 = vmul.f32 %v1858_v35, %v308_v56  ;;  %v314_v56 = vld [vmem:[%s1935_s28 + $0x2c8] sm:$0xff] }
  0x70   : > { %1289 = vmatprep.subr.mxu1 %v592_v14  ;;  %980 = vmatpush1.msra.mxu0 %v591_v23  ;;  %v588_v14 = vld [vmem:[%s2802_s2 + $0x458] sm:$0xff]  ;;  %2810 = vst [vmem:[#allocation8_spill] sm:$0xff] %v2288_v29  ;;  %v2299_v43 = vmul.f32 %v1861_v36, %v259_v32  ;;  %v2305_v54 = vmul.f32 %v1858_v35, %v266_v45  ;;  %v313_v29 = vld [vmem:[%s1935_s28 + $0x2c0] sm:$0xff] }
  0x71   : > { %1321 = vmatpush1.msra.mxu1 %v591_v23  ;;  %981 = vmatprep.subr.mxu0 %v590_v33  ;;  %v587_v23 = vld [vmem:[%s2802_s2 + $0x450] sm:$0xff]  ;;  %2811 = vst [vmem:[#allocation9_spill] sm:$0xff] %v2291_v30  ;;  %v265_v30 = vld [vmem:[%s1935_s28 + $0x140] sm:$0xff]  ;;  %v2311_v21 = vmul.f32 %v1858_v35, %v314_v56  ;;  %v272_v32 = vld [vmem:[%s1935_s28 + $0x178] sm:$0xff] }
  0x72   : > { %1290 = vmatprep.subr.mxu1 %v590_v33  ;;  %v307_v33 = vld [vmem:[%s1935_s28 + $0x290] sm:$0xff]  ;;  %735 = vmatprep.mubr.f32.mxu0 %v2146_v53  ;;  %v2314_v53 = vmul.f32 %v1861_v36, %v265_v30  ;;  %v2328_v45 = vmul.f32 %v1858_v35, %v272_v32  ;;  %v391_v32 = vmul.f32 %v1978_v11, %v263_v18 }
  0x73   : > { %896 = vmatprep.mubr.f32.mxu1 %v2158_v61  ;;  %v2302_v49 = vmul.f32 %v1861_v36, %v307_v33  ;;  %982 = vmatpush1.msra.mxu0 %v589_v59  ;;  %v2317_v61 = vmul.f32 %v1861_v36, %v313_v29  ;;  %v320_v33 = vld [vmem:[%s1935_s28 + $0x2f8] sm:$0xff]  ;;  %v319_v56 = vld [vmem:[%s1935_s28 + $0x2f0] sm:$0xff] }
  0x74   : > { %1322 = vmatpush1.msra.mxu1 %v589_v59  ;;  %736 = vmatmul.mubr.f32.gmra.mxu0 %v2171_v4  ;;  %v586_v59 = vld [vmem:[%s2802_s2 + $0x448] sm:$0xff]  ;;  %v2331_v30 = vmul.f32 %v1858_v35, %v320_v33  ;;  %v2338_v4 = vmul.f32 %v1861_v36, %v319_v56  ;;  %v389_v35 = vmul.f32 %v1975_v10, %v261_v12  ;;  %v269_v12 = vld [vmem:[%s1935_s28 + $0x160] sm:$0xff] }
  0x75   : > { %2812 = vst [vmem:[#allocation10_spill] sm:$0xff] %v2302_v49  ;;  %v271_v49 = vld [vmem:[%s1935_s28 + $0x170] sm:$0xff]  ;;  %897 = vmatmul.mubr.f32.gmra.mxu1 %v2174_v8  ;;  %983 = vmatprep.subr.mxu0 %v588_v14  ;;  %v585_v8 = vld [vmem:[%s2802_s2 + $0x440] sm:$0xff]  ;;  %v270_v33 = vld [vmem:[%s1935_s28 + $0x168] sm:$0xff] }
  0x76   : > { %v2334_v29 = vmul.f32 %v1861_v36, %v271_v49  ;;  %1291 = vmatprep.subr.mxu1 %v588_v14  ;;  %984 = vmatpush1.msra.mxu0 %v587_v23  ;;  %v268_v49 = vld [vmem:[%s1935_s28 + $0x158] sm:$0xff]  ;;  %v583_v14 = vld [vmem:[%s2802_s2 + $0x430] sm:$0xff]  ;;  %v398_v18 = vmul.f32 %v1965_v6, %v270_v33 }
  0x77   : > { %1323 = vmatpush1.msra.mxu1 %v587_v23  ;;  %985 = vmatprep.subr.mxu0 %v586_v59  ;;  %v584_v36 = vld [vmem:[%s2802_s2 + $0x438] sm:$0xff]  ;;  %v267_v23 = vld [vmem:[%s1935_s28 + $0x150] sm:$0xff] }
  0x78   : > { %1292 = vmatprep.subr.mxu1 %v586_v59  ;;  %741 = vmatprep.mubr.f32.mxu0 %v2184_v15  ;;  %v582_v15 = vld [vmem:[%s2802_s2 + $0x428] sm:$0xff]  ;;  %v581_v59 = vld [vmem:[%s2802_s2 + $0x420] sm:$0xff]  ;;  %v395_v56 = vmul.f32 %v1975_v10, %v267_v23  ;;  %v579_v33 = vld [vmem:[%s2802_s2 + $0x410] sm:$0xff] }
  0x79   : > { %902 = vmatprep.mubr.f32.mxu1 %v2187_v16  ;;  %986 = vmatpush1.msra.mxu0 %v585_v8  ;;  %v396_v16 = vmul.f32 %v1955_v2, %v268_v49  ;;  %v580_v49 = vld [vmem:[%s2802_s2 + $0x418] sm:$0xff]  ;;  %v578_v23 = vld [vmem:[%s2802_s2 + $0x408] sm:$0xff] }
  0x7a   : > { %1324 = vmatpush1.msra.mxu1 %v585_v8  ;;  %742 = vmatmul.mubr.f32.gmra.mxu0 %v389_v35  ;;  %v397_v8 = vmul.f32 %v1978_v11, %v269_v12  ;;  %v274_v35 = vld [vmem:[%s1935_s28 + $0x188] sm:$0xff] }
  0x7b   : > { %903 = vmatmul.mubr.f32.gmra.mxu1 %v391_v32  ;;  %987 = vmatprep.subr.mxu0 %v584_v36  ;;  %v276_v32 = vld [vmem:[%s1935_s28 + $0x198] sm:$0xff]  ;;  %v402_v12 = vmul.f32 %v1955_v2, %v274_v35 }
  0x7c   : > { %1293 = vmatprep.subr.mxu1 %v584_v36  ;;  %988 = vmatpush1.msra.mxu0 %v583_v14  ;;  %v273_v36 = vld [vmem:[%s1935_s28 + $0x180] sm:$0xff]  ;;  %v640_v35 = vld [vmem:[%s2802_s2 + $0x5f8] sm:$0xff] }
  0x7d   : > { %1325 = vmatpush1.msra.mxu1 %v583_v14  ;;  %989 = vmatprep.subr.mxu0 %v582_v15  ;;  %v275_v14 = vld [vmem:[%s1935_s28 + $0x190] sm:$0xff] }
  0x7e   : > { %1294 = vmatprep.subr.mxu1 %v582_v15  ;;  %747 = vmatprep.mubr.f32.mxu0 %v396_v16  ;;  %v404_v15 = vmul.f32 %v1965_v6, %v276_v32  ;;  %v577_v16 = vld [vmem:[%s2802_s2 + $0x400] sm:$0xff]  ;;  %v639_v32 = vld [vmem:[%s2802_s2 + $0x5f0] sm:$0xff] }
  0x7f   : > { %908 = vmatprep.mubr.f32.mxu1 %v398_v18  ;;  %990 = vmatpush1.msra.mxu0 %v581_v59  ;;  %v401_v18 = vmul.f32 %v1975_v10, %v273_v36  ;;  %v638_v36 = vld [vmem:[%s2802_s2 + $0x5e8] sm:$0xff] }
  0x80   : > { %1326 = vmatpush1.msra.mxu1 %v581_v59  ;;  %748 = vmatmul.mubr.f32.gmra.mxu0 %v395_v56  ;;  %v403_v59 = vmul.f32 %v1978_v11, %v275_v14  ;;  %v280_v56 = vld [vmem:[%s1935_s28 + $0x1b8] sm:$0xff] }
  0x81   : > { %909 = vmatmul.mubr.f32.gmra.mxu1 %v397_v8  ;;  %991 = vmatprep.subr.mxu0 %v580_v49  ;;  %v282_v8 = vld [vmem:[%s1935_s28 + $0x1c8] sm:$0xff]  ;;  %v408_v14 = vmul.f32 %v1955_v2, %v280_v56  ;;  %v636_v56 = vld [vmem:[%s2802_s2 + $0x5d8] sm:$0xff] }
  0x82   : > { %1295 = vmatprep.subr.mxu1 %v580_v49  ;;  %992 = vmatpush1.msra.mxu0 %v579_v33  ;;  %v279_v49 = vld [vmem:[%s1935_s28 + $0x1b0] sm:$0xff] }
  0x83   : > { %1327 = vmatpush1.msra.mxu1 %v579_v33  ;;  %993 = vmatprep.subr.mxu0 %v578_v23  ;;  %v281_v33 = vld [vmem:[%s1935_s28 + $0x1c0] sm:$0xff] }
  0x84   : > { %1296 = vmatprep.subr.mxu1 %v578_v23  ;;  %753 = vmatprep.mubr.f32.mxu0 %v402_v12  ;;  %v410_v23 = vmul.f32 %v1965_v6, %v282_v8  ;;  %v637_v12 = vld [vmem:[%s2802_s2 + $0x5e0] sm:$0xff]  ;;  %v635_v8 = vld [vmem:[%s2802_s2 + $0x5d0] sm:$0xff] }
  0x85   : > { %914 = vmatprep.mubr.f32.mxu1 %v404_v15  ;;  %994 = vmatpush1.msra.mxu0 %v577_v16  ;;  %v407_v15 = vmul.f32 %v1975_v10, %v279_v49  ;;  %v634_v49 = vld [vmem:[%s2802_s2 + $0x5c8] sm:$0xff] }
  0x86   : > { %1328 = vmatpush1.msra.mxu1 %v577_v16  ;;  %754 = vmatmul.mubr.f32.gmra.mxu0 %v401_v18  ;;  %v409_v16 = vmul.f32 %v1978_v11, %v281_v33  ;;  %v286_v18 = vld [vmem:[%s1935_s28 + $0x1e8] sm:$0xff] }
  0x87   : > { %915 = vmatmul.mubr.f32.gmra.mxu1 %v403_v59  ;;  %995 = vmatprep.subr.mxu0 %v640_v35  ;;  %v288_v59 = vld [vmem:[%s1935_s28 + $0x1f8] sm:$0xff]  ;;  %v414_v33 = vmul.f32 %v1955_v2, %v286_v18 }
  0x88   : > { %1297 = vmatprep.subr.mxu1 %v640_v35  ;;  %996 = vmatpush2.msra.mxu0 %v639_v32  ;;  %v285_v35 = vld [vmem:[%s1935_s28 + $0x1e0] sm:$0xff]  ;;  %v632_v2 = vld [vmem:[%s2802_s2 + $0x5b8] sm:$0xff] }
  0x89   : > { %1329 = vmatpush2.msra.mxu1 %v639_v32  ;;  %997 = vmatprep.subr.mxu0 %v638_v36  ;;  %v287_v32 = vld [vmem:[%s1935_s28 + $0x1f0] sm:$0xff]  ;;  %s1280_s28 = sshll.u32 %s1471_s15, 12 }
  0x8a   : > { %1298 = vmatprep.subr.mxu1 %v638_v36  ;;  %759 = vmatprep.mubr.f32.mxu0 %v408_v14  ;;  %v416_v36 = vmul.f32 %v1965_v6, %v288_v59  ;;  %v633_v14 = vld [vmem:[%s2802_s2 + $0x5c0] sm:$0xff]  ;;  %v631_v6 = vld [vmem:[%s2802_s2 + $0x5b0] sm:$0xff]  ;;  %s2745_s26 = scalar_lea.hbm %s2803_s3, %s1280_s28 }
  0x8b   : > { %920 = vmatprep.mubr.f32.mxu1 %v410_v23  ;;  %998 = vmatpush2.msra.mxu0 %v637_v12  ;;  %v413_v23 = vmul.f32 %v1975_v10, %v285_v35  ;;  %v630_v10 = vld [vmem:[%s2802_s2 + $0x5a8] sm:$0xff] }
  0x8c   : > { %1330 = vmatpush2.msra.mxu1 %v637_v12  ;;  %760 = vmatmul.mubr.f32.gmra.mxu0 %v407_v15  ;;  %v415_v12 = vmul.f32 %v1978_v11, %v287_v32  ;;  %v629_v11 = vld [vmem:[%s2802_s2 + $0x5a0] sm:$0xff]  ;;  %v628_v15 = vld [vmem:[%s2802_s2 + $0x598] sm:$0xff] }
  0x8d   : > { %921 = vmatmul.mubr.f32.gmra.mxu1 %v409_v16  ;;  %999 = vmatprep.subr.mxu0 %v636_v56  ;;  %v627_v16 = vld [vmem:[%s2802_s2 + $0x590] sm:$0xff] }
  0x8e   : > { %1299 = vmatprep.subr.mxu1 %v636_v56  ;;  %1000 = vmatpush2.msra.mxu0 %v635_v8 }
  0x8f   : > { %1331 = vmatpush2.msra.mxu1 %v635_v8  ;;  %1001 = vmatprep.subr.mxu0 %v634_v49 }
  0x90   : > { %1300 = vmatprep.subr.mxu1 %v634_v49  ;;  %765 = vmatprep.mubr.f32.mxu0 %v414_v33 }
  0x91   : > { %926 = vmatprep.mubr.f32.mxu1 %v416_v36  ;;  %1002 = vmatpush2.msra.mxu0 %v633_v14 }
  0x92   : > { %1332 = vmatpush2.msra.mxu1 %v633_v14  ;;  %766 = vmatmul.mubr.f32.gmra.mxu0 %v413_v23 }
  0x93   : > { %927 = vmatmul.mubr.f32.gmra.mxu1 %v415_v12  ;;  %1003 = vmatprep.subr.mxu0 %v632_v2 }
  0x94   : > { %1301 = vmatprep.subr.mxu1 %v632_v2  ;;  %1004 = vmatpush2.msra.mxu0 %v631_v6 }
  0x95   : > { %1333 = vmatpush2.msra.mxu1 %v631_v6  ;;  %1005 = vmatprep.subr.mxu0 %v630_v10 }
  0x96   : > { %1302 = vmatprep.subr.mxu1 %v630_v10  ;;  %771 = vmatprep.mubr.f32.mxu0 %v2043_v50  ;;  %v626_v50 = vld [vmem:[%s2802_s2 + $0x588] sm:$0xff] }
  0x97   : > { %932 = vmatprep.mubr.f32.mxu1 %v2046_v51  ;;  %1006 = vmatpush2.msra.mxu0 %v629_v11  ;;  %v625_v51 = vld [vmem:[%s2802_s2 + $0x580] sm:$0xff] }
  0x98   : > { %1334 = vmatpush2.msra.mxu1 %v629_v11  ;;  %772 = vmatmul.mubr.f32.gmra.mxu0 %v2056_v57  ;;  %v624_v57 = vld [vmem:[%s2802_s2 + $0x578] sm:$0xff] }
  0x99   : > { %933 = vmatmul.mubr.f32.gmra.mxu1 %v2059_v58  ;;  %1007 = vmatprep.subr.mxu0 %v628_v15  ;;  %v623_v58 = vld [vmem:[%s2802_s2 + $0x570] sm:$0xff] }
  0x9a   : > { %1303 = vmatprep.subr.mxu1 %v628_v15  ;;  %1008 = vmatpush2.msra.mxu0 %v627_v16 }
  0x9b   : > { %1335 = vmatpush2.msra.mxu1 %v627_v16  ;;  %1009 = vmatprep.subr.mxu0 %v626_v50 }
  0x9c   : > { %1304 = vmatprep.subr.mxu1 %v626_v50  ;;  %777 = vmatprep.mubr.f32.mxu0 %v2067_v62  ;;  %v622_v62 = vld [vmem:[%s2802_s2 + $0x568] sm:$0xff] }
  0x9d   : > { %938 = vmatprep.mubr.f32.mxu1 %v2077_v5  ;;  %1010 = vmatpush2.msra.mxu0 %v625_v51  ;;  %v621_v5 = vld [vmem:[%s2802_s2 + $0x560] sm:$0xff] }
  0x9e   : > { %1336 = vmatpush2.msra.mxu1 %v625_v51  ;;  %778 = vmatmul.mubr.f32.gmra.mxu0 %v2080_v7  ;;  %v620_v7 = vld [vmem:[%s2802_s2 + $0x558] sm:$0xff] }
  0x9f   : > { %939 = vmatmul.mubr.f32.gmra.mxu1 %v2086_v13  ;;  %1011 = vmatprep.subr.mxu0 %v624_v57  ;;  %v619_v13 = vld [vmem:[%s2802_s2 + $0x550] sm:$0xff] }
  0xa0   : > { %1305 = vmatprep.subr.mxu1 %v624_v57  ;;  %1012 = vmatpush2.msra.mxu0 %v623_v58 }
  0xa1   : > { %1337 = vmatpush2.msra.mxu1 %v623_v58  ;;  %1013 = vmatprep.subr.mxu0 %v622_v62 }
  0xa2   : > { %1306 = vmatprep.subr.mxu1 %v622_v62  ;;  %783 = vmatprep.mubr.f32.mxu0 %v2096_v19  ;;  %v618_v19 = vld [vmem:[%s2802_s2 + $0x548] sm:$0xff] }
  0xa3   : > { %944 = vmatprep.mubr.f32.mxu1 %v2099_v20  ;;  %1014 = vmatpush2.msra.mxu0 %v621_v5  ;;  %v617_v20 = vld [vmem:[%s2802_s2 + $0x540] sm:$0xff] }
  0xa4   : > { %1338 = vmatpush2.msra.mxu1 %v621_v5  ;;  %784 = vmatmul.mubr.f32.gmra.mxu0 %v2107_v26  ;;  %v616_v26 = vld [vmem:[%s2802_s2 + $0x538] sm:$0xff] }
  0xa5   : > { %945 = vmatmul.mubr.f32.gmra.mxu1 %v2110_v27  ;;  %1015 = vmatprep.subr.mxu0 %v620_v7  ;;  %v615_v27 = vld [vmem:[%s2802_s2 + $0x530] sm:$0xff] }
  0xa6   : > { %1307 = vmatprep.subr.mxu1 %v620_v7  ;;  %1016 = vmatpush2.msra.mxu0 %v619_v13 }
  0xa7   : > { %1339 = vmatpush2.msra.mxu1 %v619_v13  ;;  %1017 = vmatprep.subr.mxu0 %v618_v19 }
  0xa8   : > { %1308 = vmatprep.subr.mxu1 %v618_v19  ;;  %789 = vmatprep.mubr.f32.mxu0 %v2127_v40  ;;  %v614_v40 = vld [vmem:[%s2802_s2 + $0x528] sm:$0xff] }
  0xa9   : > { %950 = vmatprep.mubr.f32.mxu1 %v2130_v41  ;;  %1018 = vmatpush2.msra.mxu0 %v617_v20  ;;  %v613_v41 = vld [vmem:[%s2802_s2 + $0x520] sm:$0xff] }
  0xaa   : > { %1340 = vmatpush2.msra.mxu1 %v617_v20  ;;  %790 = vmatmul.mubr.f32.gmra.mxu0 %v2138_v47  ;;  %v612_v47 = vld [vmem:[%s2802_s2 + $0x518] sm:$0xff] }
  0xab   : > { %951 = vmatmul.mubr.f32.gmra.mxu1 %v2141_v48  ;;  %1019 = vmatprep.subr.mxu0 %v616_v26  ;;  %v611_v48 = vld [vmem:[%s2802_s2 + $0x510] sm:$0xff] }
  0xac   : > { %1309 = vmatprep.subr.mxu1 %v616_v26  ;;  %1020 = vmatpush2.msra.mxu0 %v615_v27 }
  0xad   : > { %1341 = vmatpush2.msra.mxu1 %v615_v27  ;;  %1021 = vmatprep.subr.mxu0 %v614_v40 }
  0xae   : > { %1310 = vmatprep.subr.mxu1 %v614_v40  ;;  %795 = vmatprep.mubr.f32.mxu0 %v2150_v55  ;;  %v610_v55 = vld [vmem:[%s2802_s2 + $0x508] sm:$0xff] }
  0xaf   : > { %956 = vmatprep.mubr.f32.mxu1 %v2161_v63  ;;  %1022 = vmatpush2.msra.mxu0 %v613_v41  ;;  %v609_v63 = vld [vmem:[%s2802_s2 + $0x500] sm:$0xff] }
  0xb0   : > { %1342 = vmatpush2.msra.mxu1 %v613_v41  ;;  %796 = vmatmul.mubr.f32.gmra.mxu0 %v2164_v0  ;;  %v2813_v0 = vld [vmem:[#allocation5_spill] sm:$0xff] }
  0xb1   : > { %957 = vmatmul.mubr.f32.gmra.mxu1 %v2177_v9  ;;  %1023 = vmatprep.subr.mxu0 %v612_v47  ;;  %v2814_v9 = vld [vmem:[#allocation6_spill] sm:$0xff] }
  0xb2   : > { %1311 = vmatprep.subr.mxu1 %v612_v47  ;;  %1024 = vmatpush2.msra.mxu0 %v611_v48 }
  0xb3   : > { %1343 = vmatpush2.msra.mxu1 %v611_v48  ;;  %1025 = vmatprep.subr.mxu0 %v610_v55 }
  0xb4   : > { %1312 = vmatprep.subr.mxu1 %v610_v55  ;;  %1026 = vmatpush2.msra.mxu0 %v609_v63 }
  0xb5   : > { %1344 = vmatpush2.msra.mxu1 %v609_v63  ;;  %1027 = vmatprep.mubr.f32.mxu0 %v2190_v17  ;;  %v2815_v17 = vld [vmem:[#allocation7_spill] sm:$0xff] }
  0xb6   : > { %1075 = vmatprep.mubr.f32.mxu1 %v2199_v24  ;;  %1028 = vmatmul.mubr.f32.vlgmr.msra.gmra.mxu0 %v2202_v25  ;;  %v2816_v24 = vld [vmem:[#allocation8_spill] sm:$0xff]  ;;  %v2817_v25 = vld [vmem:[#allocation9_spill] sm:$0xff] }
  0xb7   : > { %1076 = vmatmul.mubr.f32.vlgmr.msra.gmra.mxu1 %v2205_v28  ;;  %1033 = vmatprep.mubr.f32.mxu0 %v2214_v34  ;;  %v2818_v28 = vld [vmem:[#allocation10_spill] sm:$0xff] }
  0xb8   : > { %1081 = vmatprep.mubr.f32.mxu1 %v2217_v37 }
  0xba   : > { %1034 = vmatmul.mubr.f32.gmra.mxu0 %v2220_v39 }
  0xbb   : > { %1082 = vmatmul.mubr.f32.gmra.mxu1 %v2226_v31  ;;  %1039 = vmatprep.mubr.f32.mxu0 %v2229_v38 }
  0xbc   : > { %1087 = vmatprep.mubr.f32.mxu1 %v2232_v46 }
  0xbe   : > { %1040 = vmatmul.mubr.f32.gmra.mxu0 %v2241_v60 }
  0xbf   : > { %1088 = vmatmul.mubr.f32.gmra.mxu1 %v2244_v1  ;;  %1045 = vmatprep.mubr.f32.mxu0 %v2247_v3 }
  0xc0   : > { %1093 = vmatprep.mubr.f32.mxu1 %v2253_v44 }
  0xc2   : > { %1046 = vmatmul.mubr.f32.gmra.mxu0 %v2256_v52 }
  0xc3   : > { %1094 = vmatmul.mubr.f32.gmra.mxu1 %v2259_v22  ;;  %1051 = vmatprep.mubr.f32.mxu0 %v2268_v42 }
  0xc4   : > { %1099 = vmatprep.mubr.f32.mxu1 %v2813_v0 }
  0xc6   : > { %1052 = vmatmul.mubr.f32.gmra.mxu0 %v2814_v9 }
  0xc7   : > { %1100 = vmatmul.mubr.f32.gmra.mxu1 %v2815_v17  ;;  %1057 = vmatprep.mubr.f32.mxu0 %v2816_v24 }
  0xc8   : > { %1105 = vmatprep.mubr.f32.mxu1 %v2817_v25 }
  0xca   : > { %1058 = vmatmul.mubr.f32.gmra.mxu0 %v2299_v43 }
  0xcb   : > { %1106 = vmatmul.mubr.f32.gmra.mxu1 %v2818_v28  ;;  %1063 = vmatprep.mubr.f32.mxu0 %v2305_v54 }
  0xcc   : > { %1111 = vmatprep.mubr.f32.mxu1 %v2311_v21 }
  0xce   : > { %1064 = vmatmul.mubr.f32.gmra.mxu0 %v2314_v53 }
  0xcf   : > { %1112 = vmatmul.mubr.f32.gmra.mxu1 %v2317_v61  ;;  %1069 = vmatprep.mubr.f32.mxu0 %v2328_v45 }
  0xd0   : > { %1117 = vmatprep.mubr.f32.mxu1 %v2331_v30 }
  0xd2   : > { %1070 = vmatmul.mubr.f32.gmra.mxu0 %v2334_v29 }
  0xd3   : > { %1118 = vmatmul.mubr.f32.gmra.mxu1 %v2338_v4 }
 0x116   : > { %v2551_v34 = vpop.f32.mrf.mxu0 }
 0x117   : > { %v2553_v37 = vpop.f32.mrf.mxu1 }
 0x118   : > { %v2555_v39 = vpop.f32.mrf.mxu0 }
 0x119   : > { %v2557_v31 = vpop.f32.mrf.mxu1 }
 0x11c   : > { %v2559_v38 = vpop.f32.mrf.mxu0 }
 0x11d   : > { %v2561_v46 = vpop.f32.mrf.mxu1 }
 0x11e   : > { %v2563_v60 = vpop.f32.mrf.mxu0 }
 0x11f   : > { %v2565_v1 = vpop.f32.mrf.mxu1 }
 0x122   : > { %v2567_v3 = vpop.f32.mrf.mxu0 }
 0x123   : > { %v2569_v44 = vpop.f32.mrf.mxu1 }
 0x124   : > { %v2571_v52 = vpop.f32.mrf.mxu0 }
 0x125   : > { %v2573_v22 = vpop.f32.mrf.mxu1 }
 0x128   : > { %v2575_v42 = vpop.f32.mrf.mxu0 }
 0x129   : > { %v2577_v43 = vpop.f32.mrf.mxu1 }
 0x12a   : > { %v2579_v21 = vpop.f32.mrf.mxu0 }
 0x12b   : > { %v2581_v54 = vpop.f32.mrf.mxu1 }
 0x12e   : > { %v2583_v53 = vpop.f32.mrf.mxu0 }
 0x12f   : > { %v2585_v61 = vpop.f32.mrf.mxu1 }
 0x130   : > { %v2587_v45 = vpop.f32.mrf.mxu0 }
 0x131   : > { %v2589_v30 = vpop.f32.mrf.mxu1 }
 0x134   : > { %v2591_v29 = vpop.f32.mrf.mxu0 }
 0x135   : > { %v2593_v4 = vpop.f32.mrf.mxu1 }
 0x136   : > { %v2595_v18 = vpop.f32.mrf.mxu0 }
 0x137   : > { %v2597_v59 = vpop.f32.mrf.mxu1 }
 0x13a   : > { %v2599_v56 = vpop.f32.mrf.mxu0 }
 0x13b   : > { %v2601_v8 = vpop.f32.mrf.mxu1 }
 0x13c   : > { %v2603_v35 = vpop.f32.mrf.mxu0 }
 0x13d   : > { %2819 = vst [vmem:[#allocation5_spill] sm:$0xff] %v2603_v35  ;;  %v2605_v32 = vpop.f32.mrf.mxu1 }
 0x13e   : > { %2820 = vst [vmem:[#allocation6_spill] sm:$0xff] %v2605_v32 }
 0x140   : > { %v2607_v49 = vpop.f32.mrf.mxu0 }
 0x141   : > { %2821 = vst [vmem:[#allocation7_spill] sm:$0xff] %v2607_v49  ;;  %v2609_v33 = vpop.f32.mrf.mxu1 }
 0x142   : > { %2822 = vst [vmem:[#allocation8_spill] sm:$0xff] %v2609_v33  ;;  %v2611_v36 = vpop.f32.mrf.mxu0 }
 0x143   : > { %2823 = vst [vmem:[#allocation9_spill] sm:$0xff] %v2611_v36  ;;  %v2613_v14 = vpop.f32.mrf.mxu1 }
 0x144   : > { %2824 = vst [vmem:[#allocation10_spill] sm:$0xff] %v2613_v14  ;;  %v869_v14 = vadd.f32 %v2553_v37, %v2551_v34 }
 0x146   : > { %v755_v23 = vpop.f32.mrf.mxu0 }
 0x147   : > { %v916_v12 = vpop.f32.mrf.mxu1 }
 0x148   : > { %v757_v2 = vpop.f32.mrf.mxu0  ;;  %v917_v36 = vadd.f32 %v916_v12, %v755_v23 }
 0x149   : > { %v918_v6 = vpop.f32.mrf.mxu1 }
 0x14c   : > { %v761_v10 = vpop.f32.mrf.mxu0 }
 0x14d   : > { %v922_v11 = vpop.f32.mrf.mxu1 }
 0x14e   : > { %v763_v15 = vpop.f32.mrf.mxu0 }
 0x14f   : > { %v924_v16 = vpop.f32.mrf.mxu1 }
 0x152   : > { %v767_v50 = vpop.f32.mrf.mxu0 }
 0x153   : > { %v928_v51 = vpop.f32.mrf.mxu1 }
 0x154   : > { %v769_v57 = vpop.f32.mrf.mxu0  ;;  %v929_v23 = vadd.f32 %v928_v51, %v767_v50 }
 0x155   : > { %v930_v58 = vpop.f32.mrf.mxu1 }
 0x158   : > { %v2615_v62 = vpop.f32.mrf.mxu0 }
 0x159   : > { %v2617_v5 = vpop.f32.mrf.mxu1 }
 0x15a   : > { %v2619_v7 = vpop.f32.mrf.mxu0 }
 0x15b   : > { %v2621_v13 = vpop.f32.mrf.mxu1 }
 0x15e   : > { %v2623_v19 = vpop.f32.mrf.mxu0 }
 0x15f   : > { %v2625_v20 = vpop.f32.mrf.mxu1 }
 0x160   : > { %v2627_v26 = vpop.f32.mrf.mxu0 }
 0x161   : > { %v2629_v27 = vpop.f32.mrf.mxu1 }
 0x164   : > { %v2631_v40 = vpop.f32.mrf.mxu0 }
 0x165   : > { %v2633_v41 = vpop.f32.mrf.mxu1 }
 0x166   : > { %v2635_v47 = vpop.f32.mrf.mxu0 }
 0x167   : > { %v2637_v48 = vpop.f32.mrf.mxu1 }
 0x16a   : > { %v2639_v55 = vpop.f32.mrf.mxu0 }
 0x16b   : > { %v2641_v63 = vpop.f32.mrf.mxu1 }
 0x16c   : > { %v2643_v0 = vpop.f32.mrf.mxu0 }
 0x16d   : > { %2825 = vst [vmem:[#allocation11_spill] sm:$0xff] %v2643_v0  ;;  %v2645_v9 = vpop.f32.mrf.mxu1  ;;  %v919_v0 = vadd.f32 %v918_v6, %v757_v2  ;;  %v883_v2 = vadd.f32 %v2573_v22, %v2571_v52  ;;  %v931_v6 = vadd.f32 %v930_v58, %v769_v57  ;;  %v889_v57 = vadd.f32 %v2581_v54, %v2579_v21 }
 0x16e   : > { %2826 = vst [vmem:[#allocation12_spill] sm:$0xff] %v2645_v9  ;;  %v871_v9 = vadd.f32 %v2557_v31, %v2555_v39  ;;  %v937_v58 = vadd.f32 %v2621_v13, %v2619_v7 }
 0x170   : > { %v2647_v17 = vpop.f32.mrf.mxu0 }
 0x171   : > { %2827 = vst [vmem:[#allocation13_spill] sm:$0xff] %v2647_v17  ;;  %v2649_v24 = vpop.f32.mrf.mxu1 }
 0x172   : > { %2828 = vst [vmem:[#allocation14_spill] sm:$0xff] %v2649_v24  ;;  %v2652_v25 = vpop.f32.mrf.mxu0 }
 0x173   : > { %2829 = vst [vmem:[#allocation15_spill] sm:$0xff] %v2652_v25  ;;  %v2654_v28 = vpop.f32.mrf.mxu1  ;;  %v875_v25 = vadd.f32 %v2561_v46, %v2559_v38 }
 0x174   : > { %2830 = vst [vmem:[#allocation16_spill] sm:$0xff] %v2654_v28  ;;  %v923_v28 = vadd.f32 %v922_v11, %v761_v10 }
 0x176   : > { %v1029_v33 = vpop.f32.mrf.mxu0 }
 0x177   : > { %v1077_v49 = vpop.f32.mrf.mxu1  ;;  %v1030_v17 = vadd.f32 %v1029_v33, %v869_v14  ;;  %v925_v33 = vadd.f32 %v924_v16, %v763_v15  ;;  %v887_v15 = vadd.f32 %v2577_v43, %v2575_v42  ;;  %v935_v16 = vadd.f32 %v2617_v5, %v2615_v62 }
 0x178   : > { %v1078_v32 = vadd.f32 %v1077_v49, %v917_v36  ;;  %v1031_v24 = vpop.f32.mrf.mxu0  ;;  %v877_v49 = vadd.f32 %v2565_v1, %v2563_v60 }
 0x179   : > { %v1079_v35 = vpop.f32.mrf.mxu1  ;;  %1124 = vst [vmem:[%s2664_s11] sm:$0xff] %v1030_v17  ;;  %v1032_v34 = vadd.f32 %v1031_v24, %v871_v9  ;;  %v941_v9 = vadd.f32 %v2625_v20, %v2623_v19  ;;  %v895_v17 = vadd.f32 %v2589_v30, %v2587_v45  ;;  %v943_v24 = vadd.f32 %v2629_v27, %v2627_v26 }
 0x17a   : > { %1140 = vst [vmem:[%s2664_s11 + $0x80] sm:$0xff] %v1078_v32  ;;  %v1080_v37 = vadd.f32 %v1079_v35, %v919_v0  ;;  %v1035_v39 = vpop.f32.mrf.mxu0  ;;  %v881_v32 = vadd.f32 %v2569_v44, %v2567_v3  ;;  %v893_v0 = vadd.f32 %v2585_v61, %v2583_v53 }
 0x17b   : > { %v1083_v31 = vpop.f32.mrf.mxu1  ;;  %1125 = vst [vmem:[%s2664_s11 + $0x8] sm:$0xff] %v1032_v34  ;;  %v1036_v38 = vadd.f32 %v1035_v39, %v875_v25  ;;  %v899_v25 = vadd.f32 %v2593_v4, %v2591_v29  ;;  %v901_v34 = vadd.f32 %v2597_v59, %v2595_v18  ;;  %v905_v39 = vadd.f32 %v2601_v8, %v2599_v56 }
 0x17c   : > { %1141 = vst [vmem:[%s2664_s11 + $0x88] sm:$0xff] %v1080_v37  ;;  %v1084_v46 = vadd.f32 %v1083_v31, %v923_v28  ;;  %v1037_v36 = vpop.f32.mrf.mxu0  ;;  %v947_v28 = vadd.f32 %v2633_v41, %v2631_v40  ;;  %v949_v37 = vadd.f32 %v2637_v48, %v2635_v47  ;;  %v953_v31 = vadd.f32 %v2641_v63, %v2639_v55 }
 0x17d   : > { %v1085_v14 = vpop.f32.mrf.mxu1  ;;  %1126 = vst [vmem:[%s2664_s11 + $0x10] sm:$0xff] %v1036_v38  ;;  %v1038_v35 = vadd.f32 %v1037_v36, %v877_v49  ;;  %v2831_v49 = vld [vmem:[#allocation5_spill] sm:$0xff]  ;;  %v2834_v36 = vld [vmem:[#allocation12_spill] sm:$0xff] }
 0x17e   : > { %1142 = vst [vmem:[%s2664_s11 + $0x90] sm:$0xff] %v1084_v46  ;;  %v1086_v12 = vadd.f32 %v1085_v14, %v925_v33  ;;  %v1041_v60 = vpop.f32.mrf.mxu0  ;;  %v2832_v33 = vld [vmem:[#allocation6_spill] sm:$0xff]  ;;  %v2833_v46 = vld [vmem:[#allocation11_spill] sm:$0xff] }
 0x17f   : > { %v1089_v1 = vpop.f32.mrf.mxu1  ;;  %1127 = vst [vmem:[%s2664_s11 + $0x18] sm:$0xff] %v1038_v35  ;;  %v1042_v10 = vadd.f32 %v1041_v60, %v881_v32  ;;  %v907_v38 = vadd.f32 %v2832_v33, %v2831_v49  ;;  %v955_v14 = vadd.f32 %v2834_v36, %v2833_v46  ;;  %v2835_v32 = vld [vmem:[#allocation7_spill] sm:$0xff]  ;;  %v2838_v60 = vld [vmem:[#allocation14_spill] sm:$0xff] }
 0x180   : > { %1143 = vst [vmem:[%s2664_s11 + $0x98] sm:$0xff] %v1086_v12  ;;  %v1090_v11 = vadd.f32 %v1089_v1, %v929_v23  ;;  %v1043_v3 = vpop.f32.mrf.mxu0  ;;  %v2836_v23 = vld [vmem:[#allocation8_spill] sm:$0xff]  ;;  %v2837_v12 = vld [vmem:[#allocation13_spill] sm:$0xff] }
 0x181   : > { %v1091_v44 = vpop.f32.mrf.mxu1  ;;  %1128 = vst [vmem:[%s2664_s11 + $0x20] sm:$0xff] %v1042_v10  ;;  %v1044_v52 = vadd.f32 %v1043_v3, %v883_v2  ;;  %v911_v35 = vadd.f32 %v2836_v23, %v2835_v32  ;;  %v959_v1 = vadd.f32 %v2838_v60, %v2837_v12  ;;  %v2839_v3 = vld [vmem:[#allocation9_spill] sm:$0xff] }
 0x182   : > { %1144 = vst [vmem:[%s2664_s11 + $0xa0] sm:$0xff] %v1090_v11  ;;  %v1092_v22 = vadd.f32 %v1091_v44, %v931_v6  ;;  %v1047_v50 = vpop.f32.mrf.mxu0  ;;  %v2840_v44 = vld [vmem:[#allocation10_spill] sm:$0xff] }
 0x183   : > { %v1095_v51 = vpop.f32.mrf.mxu1  ;;  %1129 = vst [vmem:[%s2664_s11 + $0x28] sm:$0xff] %v1044_v52  ;;  %v1048_v42 = vadd.f32 %v1047_v50, %v887_v15  ;;  %v913_v15 = vadd.f32 %v2840_v44, %v2839_v3  ;;  %v2842_v52 = vld [vmem:[#allocation16_spill] sm:$0xff] }
 0x184   : > { %1145 = vst [vmem:[%s2664_s11 + $0xa8] sm:$0xff] %v1092_v22  ;;  %v1096_v43 = vadd.f32 %v1095_v51, %v935_v16  ;;  %v1049_v62 = vpop.f32.mrf.mxu0  ;;  %v2841_v16 = vld [vmem:[#allocation15_spill] sm:$0xff] }
 0x185   : > { %v1097_v5 = vpop.f32.mrf.mxu1  ;;  %1130 = vst [vmem:[%s2664_s11 + $0x30] sm:$0xff] %v1048_v42  ;;  %v1050_v21 = vadd.f32 %v1049_v62, %v889_v57  ;;  %v961_v22 = vadd.f32 %v2842_v52, %v2841_v16 }
 0x186   : > { %1146 = vst [vmem:[%s2664_s11 + $0xb0] sm:$0xff] %v1096_v43  ;;  %v1098_v54 = vadd.f32 %v1097_v5, %v937_v58  ;;  %v1053_v7 = vpop.f32.mrf.mxu0 }
 0x187   : > { %v1101_v13 = vpop.f32.mrf.mxu1  ;;  %1131 = vst [vmem:[%s2664_s11 + $0x38] sm:$0xff] %v1050_v21  ;;  %v1054_v53 = vadd.f32 %v1053_v7, %v893_v0 }
 0x188   : > { %1147 = vst [vmem:[%s2664_s11 + $0xb8] sm:$0xff] %v1098_v54  ;;  %v1102_v61 = vadd.f32 %v1101_v13, %v941_v9  ;;  %v1055_v19 = vpop.f32.mrf.mxu0 }
 0x189   : > { %v1103_v20 = vpop.f32.mrf.mxu1  ;;  %1132 = vst [vmem:[%s2664_s11 + $0x40] sm:$0xff] %v1054_v53  ;;  %v1056_v45 = vadd.f32 %v1055_v19, %v895_v17 }
 0x18a   : > { %1148 = vst [vmem:[%s2664_s11 + $0xc0] sm:$0xff] %v1102_v61  ;;  %v1104_v30 = vadd.f32 %v1103_v20, %v943_v24  ;;  %v1059_v26 = vpop.f32.mrf.mxu0 }
 0x18b   : > { %v1107_v27 = vpop.f32.mrf.mxu1  ;;  %1133 = vst [vmem:[%s2664_s11 + $0x48] sm:$0xff] %v1056_v45  ;;  %v1060_v29 = vadd.f32 %v1059_v26, %v899_v25 }
 0x18c   : > { %1149 = vst [vmem:[%s2664_s11 + $0xc8] sm:$0xff] %v1104_v30  ;;  %v1108_v4 = vadd.f32 %v1107_v27, %v947_v28  ;;  %v1061_v40 = vpop.f32.mrf.mxu0 }
 0x18d   : > { %v1109_v41 = vpop.f32.mrf.mxu1  ;;  %1134 = vst [vmem:[%s2664_s11 + $0x50] sm:$0xff] %v1060_v29  ;;  %v1062_v18 = vadd.f32 %v1061_v40, %v901_v34 }
 0x18e   : > { %1150 = vst [vmem:[%s2664_s11 + $0xd0] sm:$0xff] %v1108_v4  ;;  %v1110_v59 = vadd.f32 %v1109_v41, %v949_v37  ;;  %v1065_v47 = vpop.f32.mrf.mxu0 }
 0x18f   : > { %v1113_v48 = vpop.f32.mrf.mxu1  ;;  %1135 = vst [vmem:[%s2664_s11 + $0x58] sm:$0xff] %v1062_v18  ;;  %v1066_v56 = vadd.f32 %v1065_v47, %v905_v39 }
 0x190   : > { %1151 = vst [vmem:[%s2664_s11 + $0xd8] sm:$0xff] %v1110_v59  ;;  %v1114_v8 = vadd.f32 %v1113_v48, %v953_v31  ;;  %v1067_v55 = vpop.f32.mrf.mxu0 }
 0x191   : > { %v1115_v63 = vpop.f32.mrf.mxu1  ;;  %1136 = vst [vmem:[%s2664_s11 + $0x60] sm:$0xff] %v1066_v56  ;;  %v1068_v2 = vadd.f32 %v1067_v55, %v907_v38 }
 0x192   : > { %1152 = vst [vmem:[%s2664_s11 + $0xe0] sm:$0xff] %v1114_v8  ;;  %v1116_v6 = vadd.f32 %v1115_v63, %v955_v14  ;;  %v1071_v10 = vpop.f32.mrf.mxu0 }
 0x193   : > { %v1119_v11 = vpop.f32.mrf.mxu1  ;;  %1137 = vst [vmem:[%s2664_s11 + $0x68] sm:$0xff] %v1068_v2  ;;  %v1072_v50 = vadd.f32 %v1071_v10, %v911_v35 }
 0x194   : > { %1153 = vst [vmem:[%s2664_s11 + $0xe8] sm:$0xff] %v1116_v6  ;;  %v1120_v51 = vadd.f32 %v1119_v11, %v959_v1  ;;  %v1073_v57 = vpop.f32.mrf.mxu0 }
 0x195   : > { %v1121_v58 = vpop.f32.mrf.mxu1  ;;  %1138 = vst [vmem:[%s2664_s11 + $0x70] sm:$0xff] %v1072_v50  ;;  %v1074_v42 = vadd.f32 %v1073_v57, %v913_v15 }
 0x196   : > { %1154 = vst [vmem:[%s2664_s11 + $0xf0] sm:$0xff] %v1120_v51  ;;  %v1122_v43 = vadd.f32 %v1121_v58, %v961_v22 }
 0x197   : > { %1139 = vst [vmem:[%s2664_s11 + $0x78] sm:$0xff] %v1074_v42 }
 0x198   : > { %1155 = vst [vmem:[%s2664_s11 + $0xf8] sm:$0xff] %v1122_v43 }
 0x199   : > { %1416 = shalt.err (!%p1413_p5)
}
 0x19a   : > { %s1417_s23 = scalar_lea.hbm %s2745_s26, 4096  ;;  %s1421_s6 = scalar_lea.hbm %s2803_s3, 16384 }
 0x19b   : > { %p1418_p6 = scmp.ne.s32.totalorder %s2745_s26, %s1417_s23  ;;  %p1422_p10 = scmp.lt.s32.totalorder %s2745_s26, %s2803_s3 }
 0x19c   : > { %p1423_p11 = scmp.lt.s32.totalorder %s1421_s6, %s1417_s23 }
 0x19d   : > { %p1419_p7 = pnand %p1418_p6, %p1544_p4 }
 0x19e   : > { %p1424_p12 = por %p1423_p11, %p1422_p10 }
 0x19f   : > { %p1420_p9 = pneg %p1419_p7 }
 0x1a1   : > { %p1425_p13 = pnand %p1424_p12, %p1420_p9 }
 0x1a3   : > { %1428 = shalt.err (!%p1425_p13)
}
 0x1a4   : > { %s1482_s9 = smov 256   ;;  %s1483_s11 = smov 16  }
 0x1a5   : > { %1346 = dma.vmem_to_hbm [thread:$0]  (%p1544_p4), %s2747_s18, 4096, %s2745_s26, %s2755_s27, %s1482_s9, %s1482_s9, %s1483_s11  }
 0x1a6 PF: > { %p1352_p0 = scmp.ge.s32.totalorder %s1479_s17, 2  ;;  %s1188_s28 = sand.u32 1, %s1459_s12  }
 0x1a7   : > { %s1189_s15 = scalar_lea.sflag [#allocation3], %s1188_s28 }
 0x1a8   : > { %p1349_p1 = pnand %p1352_p0, %p1551_p8 }
 0x1aa   : > { %p1350_p2 = pneg %p1349_p1 }
 0x1ac   : > { %1454 = dma.done.wait (%p1350_p2), %s1189_s15, 4096  }
 0x1ad   : > { %1456 = vsyncadd (%p1350_p2), %s1189_s15, 4294963200  ;;  %s16_s17 = sadd.s32 1, %s1479_s17   ;;  %s2843_s12 = smov %s1463_s13 }
 0x1ae   : > { %p13_p3 = scmp.ge.s32.totalorder %s16_s17, 6   ;;  %s2844_s13 = smov %s1467_s14 }
 0x1af   : > { %s2845_s14 = smov %s1557_s25  ;;  %s2846_s15 = smov %s1475_s16 }
 0x1b0   : > { %s2847_s16 = smov %s2849_s20  ;;  %15 = sbr.rel (!%p13_p3) target bundleno = 4 (0x4), region = 70 }
 0x1b5   :  { %1194 = vsyncpa [#allocation3], 1 }
 0x1b6   :  { %1196 = vsyncpa [#allocation3 + $0x1], 1 }

</bundles_post_ra>
